<compile_context>
chip_gen: v7x
topology: tpu7x:2x2x1
jax: 0.10.0
libtpu: 0.0.40
codegen_flags: <defaults>
</compile_context>

<pallas_src>
import math

import numpy as np
import jax
import jax.numpy as jnp
from jax.experimental import pallas as pl
from jax.experimental.pallas import tpu as pltpu
from jax.scipy.special import gammaln


# ----------------------------------------------------------------------------
# Rational lgamma (Lanczos g=5, |rel err| < 2e-10, far below f32 eps).
# ----------------------------------------------------------------------------
_LG_C0 = 1.000000000190015
_LG_COEFS = (76.18009172947146, -86.50532032941677, 24.01409824083091,
             -1.231739572450155, 0.1208650973866179e-2, -0.5395239384953e-5)
_HALF_LOG_2PI = 0.5 * math.log(2.0 * math.pi)
_PI = math.pi

_LOG_01 = math.log(0.1)
_LOG_4PI = math.log(4.0 * math.pi)
_LOG_05 = math.log(0.5)
_INV_32PI2 = 1.0 / (32.0 * math.pi * math.pi)   # 1 / (2 * (4*pi)^2)


def _build_lgamma_numerator():
    """Expand c0*Prod_{j=1..6}(x+j) + sum_i c_i*Prod_{j!=i}(x+j) into a
    degree-6 polynomial in x (coefficients highest-degree first)."""
    q = np.array([1.0])
    for j in range(1, 7):
        q = np.convolve(q, [1.0, float(j)])
    p = _LG_C0 * q
    for i, c in enumerate(_LG_COEFS, start=1):
        qi = np.array([1.0])
        for j in range(1, 7):
            if j != i:
                qi = np.convolve(qi, [1.0, float(j)])
        p = p + c * np.concatenate([[0.0], qi])
    return tuple(float(v) for v in p)


_LG_P = _build_lgamma_numerator()

# Import-time sanity check (float64): split/paired form reproduces lgamma.
for _zv in (1e-6, 0.3, 1.0, 2.5, 37.0, 120.5):
    _num = 0.0
    for _c in _LG_P:
        _num = _num * _zv + _c
    _u = _zv * (_zv + 7.0)
    _den = _zv * (_u + 6.0) * (_u + 10.0) * (_u + 12.0)
    _lg = ((_zv + 0.5) * math.log(_zv + 5.5) - (_zv + 5.5)
           + _HALF_LOG_2PI + math.log(_num) - math.log(_den))
    assert abs(_lg - math.lgamma(_zv)) <= 1e-7 * max(1.0, abs(math.lgamma(_zv)))


# ----------------------------------------------------------------------------
# In-kernel math helpers (traced inside the Pallas kernel body).
# ----------------------------------------------------------------------------
def _fast_recip(x):
    # EUP approx reciprocal + one Newton step (~f32 precision).  Only used on
    # the sigmoid path; the lgamma path needs no reciprocal anymore.
    r = pl.reciprocal(x, approx=True)
    return r * (2.0 - x * r)


def _lgamma_parts(z):
    """Split Lanczos lgamma(z), z > 0, into pieces the caller can merge:

        lgamma(z) = main - (z + 5.5) + 0.5*log(2*pi) + log(num) - log(den)
        main      = (z + 0.5) * log(z + 5.5)

    Numerator: expanded degree-6 Lanczos polynomial via Horner (all-positive
    coefficients for z >= 0, no cancellation).  Denominator: paired factor
    product z*(z+1)...(z+6) = z*(u+6)*(u+10)*(u+12) with u = z*(z+7), so tiny
    z (down to the 1e-12 props floor) stays exact.  log(num)/log(den) and the
    -(z+5.5) linear parts are combined across lgammas by the caller.
    """
    num = _LG_P[0]
    for c in _LG_P[1:]:
        num = num * z + c
    u = z * (z + 7.0)
    den = z * (u + 6.0) * (u + 10.0) * (u + 12.0)
    main = (z + 0.5) * jnp.log(z + 5.5)
    return main, num, den


# ----------------------------------------------------------------------------
# Pallas kernel: one batch tile of the full forward.
# ----------------------------------------------------------------------------
def cycle_vae_kernel(x_ref, rd_ref, eps_ref, lcoef_ref,
                     w1_ref, b1_ref, w2_ref, b2_ref, w3_ref, b3_ref,
                     w4_ref, b4_ref, w5_ref, b5_ref,
                     wgT_ref, phi_ref, lgc_ref,
                     out_ref):
    x = x_ref[...]            # (Bt, G) float32 counts
    rd = rd_ref[...]          # (Bt, 1) read depth
    eps = eps_ref[...]        # (Bt, 3) reparameterization noise
    lcoef = lcoef_ref[...]    # (Bt, G) data-only lgamma term (hoisted)

    # ---- encoder MLP: 4 x ReLU(Linear) + Linear -> 6 posterior params ----
    h = jnp.maximum(jnp.dot(x, w1_ref[...], preferred_element_type=jnp.float32)
                    + b1_ref[...], 0.0)
    h = jnp.maximum(jnp.dot(h, w2_ref[...], preferred_element_type=jnp.float32)
                    + b2_ref[...], 0.0)
    h = jnp.maximum(jnp.dot(h, w3_ref[...], preferred_element_type=jnp.float32)
                    + b3_ref[...], 0.0)
    h = jnp.maximum(jnp.dot(h, w4_ref[...], preferred_element_type=jnp.float32)
                    + b4_ref[...], 0.0)
    vp = jnp.dot(h, w5_ref[...], preferred_element_type=jnp.float32) + b5_ref[...]

    # Single exp over the (Bt, 6) slab instead of four (Bt, 1) exps.
    evp = jnp.exp(vp)
    ls_r = vp[:, 1:2]; ls_t = vp[:, 3:4]; ls_z = vp[:, 5:6]      # log sigmas
    mu_r = evp[:, 0:1]; sig_r = evp[:, 1:2]
    mu_t = vp[:, 2:3];  sig_t = evp[:, 3:4]
    mu_z = vp[:, 4:5];  sig_z = evp[:, 5:6]

    # ---- reparameterized samples (rsample) ----
    r = mu_r + sig_r * eps[:, 0:1]
    thta = mu_t + sig_t * eps[:, 1:2]
    z3 = mu_z + sig_z * eps[:, 2:3]

    # ---- logits = z_mat @ W.T: contraction dim is 3, so use broadcast
    #      multiply-adds against the pre-transposed (3, G) weight.
    logits = ((r * jnp.cos(thta)) * wgT_ref[0:1, :]
              + (r * jnp.sin(thta)) * wgT_ref[1:2, :]
              + z3 * wgT_ref[2:3, :])                            # (Bt, G)

    # m = sigmoid(logits), 1-m = sigmoid(-logits): one exp + one approx
    # reciprocal; no `1 - m` cancellation.  The 1e-12 floor matches the torch
    # clip lower bound and gives the *intended* upper bound (the original
    # `1 - 1e-12` is a no-op in f32 and would let beta hit 0 -> lgamma = inf).
    lg = jnp.clip(logits, -30.0, 30.0)
    en = jnp.exp(-lg)
    inv = _fast_recip(1.0 + en)
    m = jnp.maximum(inv, 1e-12)
    om = jnp.maximum(en * inv, 1e-12)

    phi = phi_ref[...]                                           # (1, G), hoisted
    alpha = m * phi
    beta = om * phi

    # ---- BetaBinomial log-prob.
    # lprob = lcoef + lg(x+a) + lg(rd-x+b) - lg(rd+phi) - lg(a) - lg(b)
    #         + lgamma(phi)
    # Merged form: the -(z+5.5) linear parts cancel (z1+z2==z3, z4+z5==phi up
    # to f32 rounding) and are folded into lgc_ref together with lgamma(phi),
    # +phi+5.5, and -0.5*log(2pi); the ten log(num)/log(den) terms collapse to
    # six overflow-safe merged logs.
    t1, n1, d1 = _lgamma_parts(x + alpha)
    t2, n2, d2 = _lgamma_parts(rd - x + beta)
    t3, n3, d3 = _lgamma_parts(rd + phi)
    t4, n4, d4 = _lgamma_parts(alpha)
    t5, n5, d5 = _lgamma_parts(beta)

    main_sum = (t1 + t2) - (t3 + t4 + t5)
    merged_logs = (jnp.log(n1 * d4) - jnp.log(d1 * n4)
                   + jnp.log(n2 * d5) - jnp.log(d2 * n5)
                   + jnp.log(d3) - jnp.log(n3))

    lprob = lcoef + lgc_ref[...] + main_sum + merged_logs
    ell = jnp.sum(lprob, axis=1, keepdims=True)                  # (Bt, 1)

    # ---- KL(q || prior).  log(sig_q) is the raw encoder output, so the
    #      log(sig2/sig1) term needs no divide/extra log.
    #      Priors: N(1, 0.1), N(pi, 4*pi), N(-5, 0.5).
    kl_r = (_LOG_01 - ls_r) + (sig_r * sig_r + (mu_r - 1.0) ** 2) * 50.0 - 0.5
    kl_t = ((_LOG_4PI - ls_t)
            + (sig_t * sig_t + (mu_t - _PI) ** 2) * _INV_32PI2 - 0.5)
    kl_z = (_LOG_05 - ls_z) + (sig_z * sig_z + (mu_z + 5.0) ** 2) * 2.0 - 0.5
    kl = kl_r + kl_t + kl_z                                      # (Bt, 1)

    # Packed (Bt, 2) output: single store instead of two lane-width-1 stores.
    out_ref[...] = jnp.concatenate([ell, kl], axis=1)


# ----------------------------------------------------------------------------
# Wrapper
# ----------------------------------------------------------------------------
def compute_lcoef(x, read_dpth):
    """Data-only binomial-coefficient term; precompute once and reuse across
    multiple eps draws / optimizer sub-steps on the same minibatch.  NOTE: if
    callers don't pass it, the wrapper recomputes it (3 full (B,G) gammaln
    calls in XLA) every forward — pass it explicitly in hot loops."""
    xf = x.astype(jnp.float32)
    rd = jnp.reshape(read_dpth, (-1, 1)).astype(jnp.float32)
    return gammaln(rd + 1.0) - gammaln(xf + 1.0) - gammaln(rd - xf + 1.0)


def _round_up(n, m):
    return ((n + m - 1) // m) * m


def _cdiv(a, b):
    return -(-a // b)


def cycle_vae_forward(x, read_dpth, eps, params, lcoef=None, batch_tile=256):
    """Pallas-backed cycle_VAE.forward.  Returns (ELBO scalar, KL (B,))."""
    B, G = x.shape
    (W1, b1, W2, b2, W3, b3, W4, b4, W5, b5, WgT, lphi) = params
    xf = x.astype(jnp.float32)
    rd = jnp.reshape(read_dpth, (B, 1)).astype(jnp.float32)
    eps = eps.astype(jnp.float32)
    if lcoef is None:
        lcoef = compute_lcoef(xf, rd)

    # Hoisted grid-invariant (1, G) terms: phi, and the per-gene constant
    # lgamma(phi) + phi + 5.5 - 0.5*log(2pi) absorbed by the merged-lgamma
    # algebra in the kernel.
    phi = jnp.exp(lphi).astype(jnp.float32)                      # (1, G)
    lgconst = (gammaln(phi) + phi + 5.5 - _HALF_LOG_2PI).astype(jnp.float32)

    # Balanced 1-D batch grid: the axis is fully parallel (per-row outputs,
    # ELBO reduced in the wrapper).  Use >= 2 blocks whenever B >= 16 so
    # v7x's second TensorCore gets work, and balance block sizes so padding
    # never exceeds 7 rows (no last-block blow-up).  Sublane dim must be a
    # multiple of 8 -> pad with zero rows (harmless: sliced off below).
    if B >= 16:
        n_blk = max(2, _cdiv(B, batch_tile))
    else:
        n_blk = 1
    bt = _round_up(_cdiv(B, n_blk), 8)
    b_pad = bt * n_blk
    if b_pad != B:
        pad = ((0, b_pad - B), (0, 0))
        xf, rd, eps, lcoef = (jnp.pad(a, pad) for a in (xf, rd, eps, lcoef))

    row = lambda w: pl.BlockSpec((bt, w), lambda i: (i, 0))
    rep = lambda a: pl.BlockSpec(a.shape, lambda i: (0, 0))   # grid-invariant

    out = pl.pallas_call(
        cycle_vae_kernel,
        out_shape=jax.ShapeDtypeStruct((b_pad, 2), jnp.float32),
        grid=(n_blk,),
        in_specs=[row(G), row(1), row(3), row(G),
                  rep(W1), rep(b1), rep(W2), rep(b2), rep(W3), rep(b3),
                  rep(W4), rep(b4), rep(W5), rep(b5),
                  rep(WgT), rep(phi), rep(lgconst)],
        out_specs=pl.BlockSpec((bt, 2), lambda i: (i, 0)),
        compiler_params=pltpu.CompilerParams(
            dimension_semantics=("parallel",),
            vmem_limit_bytes=32 * 1024 * 1024),
    )(xf, rd, eps, lcoef,
      W1, b1, W2, b2, W3, b3, W4, b4, W5, b5, WgT, phi, lgconst)

    KL = out[:B, 1]
    elbo = jnp.sum(out[:B, 0]) - jnp.sum(KL)
    return elbo, KL


# ----------------------------------------------------------------------------
# Pure-JAX reference (mirrors the PyTorch module) for a sanity check.
# ----------------------------------------------------------------------------
def _kl_normal(mu1, sig1, mu2, sig2):
    return (jnp.log(sig2 / sig1)
            + (sig1 * sig1 + (mu1 - mu2) ** 2) / (2.0 * sig2 * sig2) - 0.5)


def _ref_forward(x, read_dpth, eps, params):
    (W1, b1, W2, b2, W3, b3, W4, b4, W5, b5, WgT, lphi) = params
    x = x.astype(jnp.float32)
    rd = read_dpth.reshape(-1, 1).astype(jnp.float32)
    h = jax.nn.relu(x @ W1 + b1)
    h = jax.nn.relu(h @ W2 + b2)
    h = jax.nn.relu(h @ W3 + b3)
    h = jax.nn.relu(h @ W4 + b4)
    vp = h @ W5 + b5
    mu_r, sig_r = jnp.exp(vp[:, 0:1]), jnp.exp(vp[:, 1:2])
    mu_t, sig_t = vp[:, 2:3], jnp.exp(vp[:, 3:4])
    mu_z, sig_z = vp[:, 4:5], jnp.exp(vp[:, 5:6])
    r = mu_r + sig_r * eps[:, 0:1]
    thta = mu_t + sig_t * eps[:, 1:2]
    z3 = mu_z + sig_z * eps[:, 2:3]
    z_mat = jnp.concatenate([r * jnp.cos(thta), r * jnp.sin(thta), z3], axis=1)
    props = jax.nn.sigmoid(z_mat @ WgT)
    m = jnp.clip(props, 1e-12, 1.0 - 1e-12)
    phi = jnp.exp(lphi)
    N, k = rd, x
    lbeta = lambda a, b: gammaln(a) + gammaln(b) - gammaln(a + b)
    lcoef = gammaln(N + 1.0) - gammaln(k + 1.0) - gammaln(N - k + 1.0)
    alpha, beta = m * phi, (1.0 - m) * phi
    ell = jnp.sum(lcoef + lbeta(k + alpha, N - k + beta) - lbeta(alpha, beta))
    KL = (_kl_normal(mu_r, sig_r, 1.0, 0.1)
          + _kl_normal(mu_t, sig_t, math.pi, 4.0 * math.pi)
          + _kl_normal(mu_z, sig_z, -5.0, 0.5))[:, 0]
    return ell - jnp.sum(KL), KL


# ----------------------------------------------------------------------------
if __name__ == "__main__":
    B, G, D = 8, 207, 24     # batch, num_genes, hidden dim (module defaults)
    key = jax.random.PRNGKey(0)
    keys = jax.random.split(key, 9)

    # Inputs: integer counts x with x <= read_depth, per-sample read depth.
    read_dpth = jax.random.randint(keys[0], (B,), 80, 121).astype(jnp.float32)
    x = jax.random.randint(keys[1], (B, G), 0, 61).astype(jnp.float32)
    eps = jax.random.normal(keys[2], (B, 3), jnp.float32)   # reparam noise

    # Deterministic parameter init (PyTorch-Linear-style uniform for encoder;
    # W = 0 * ones(G, 3) and lphi = ones(G) exactly as in __init__).
    def linear_init(k, fan_in, fan_out):
        kw, kb = jax.random.split(k)
        bound = 1.0 / math.sqrt(fan_in)
        W = jax.random.uniform(kw, (fan_in, fan_out), jnp.float32, -bound, bound)
        b = jax.random.uniform(kb, (1, fan_out), jnp.float32, -bound, bound)
        return W, b

    W1, b1 = linear_init(keys[3], G, D)
    W2, b2 = linear_init(keys[4], D, D)
    W3, b3 = linear_init(keys[5], D, D)
    W4, b4 = linear_init(keys[6], D, D)
    W5, b5 = linear_init(keys[7], D, 6)
    WgT = jnp.zeros((3, G), jnp.float32)     # self.W (G,3) = 0, pre-transposed
    lphi = jnp.ones((1, G), jnp.float32)     # self.lphi = ones(G)
    params = (W1, b1, W2, b2, W3, b3, W4, b4, W5, b5, WgT, lphi)

    elbo, kl = cycle_vae_forward(x, read_dpth, eps, params)
    jax.block_until_ready((elbo, kl))

    # Sanity check against pure-JAX reference (loose tol: f32 lgamma sums).
    elbo_ref, kl_ref = _ref_forward(x, read_dpth, eps, params)
    np.testing.assert_allclose(np.asarray(kl), np.asarray(kl_ref),
                               rtol=1e-3, atol=1e-3)
    np.testing.assert_allclose(float(elbo), float(elbo_ref),
                               rtol=2e-2, atol=1.0)

    print("KERNEL_OK")
</pallas_src>

<mosaic_0001>
module attributes {stable_mosaic.version = 11 : i64} {
  func.func @cycle_vae_kernel(%arg0: i32, %arg1: memref<8x207xf32, #tpu.memory_space<vmem>>, %arg2: memref<8x1xf32, #tpu.memory_space<vmem>>, %arg3: memref<8x3xf32, #tpu.memory_space<vmem>>, %arg4: memref<8x207xf32, #tpu.memory_space<vmem>>, %arg5: memref<207x24xf32, #tpu.memory_space<vmem>>, %arg6: memref<1x24xf32, #tpu.memory_space<vmem>>, %arg7: memref<24x24xf32, #tpu.memory_space<vmem>>, %arg8: memref<1x24xf32, #tpu.memory_space<vmem>>, %arg9: memref<24x24xf32, #tpu.memory_space<vmem>>, %arg10: memref<1x24xf32, #tpu.memory_space<vmem>>, %arg11: memref<24x24xf32, #tpu.memory_space<vmem>>, %arg12: memref<1x24xf32, #tpu.memory_space<vmem>>, %arg13: memref<24x6xf32, #tpu.memory_space<vmem>>, %arg14: memref<1x6xf32, #tpu.memory_space<vmem>>, %arg15: memref<3x207xf32, #tpu.memory_space<vmem>>, %arg16: memref<1x207xf32, #tpu.memory_space<vmem>>, %arg17: memref<1x207xf32, #tpu.memory_space<vmem>>, %arg18: memref<8x2xf32, #tpu.memory_space<vmem>>) attributes {dimension_semantics = [#tpu.dimension_semantics<parallel>], iteration_bounds = array<i64: 1>, scalar_prefetch = 0 : i64, scratch_operands = 0 : i64, tpu.core_type = #tpu.core_type<tc>, window_params = [{transform_indices = @transform_0, window_bounds = array<i64: 8, 207>}, {transform_indices = @transform_1, window_bounds = array<i64: 8, 1>}, {transform_indices = @transform_2, window_bounds = array<i64: 8, 3>}, {transform_indices = @transform_3, window_bounds = array<i64: 8, 207>}, {pipeline_mode = #tpu.pipeline_mode<synchronous>, transform_indices = @transform_4, window_bounds = array<i64: 207, 24>}, {pipeline_mode = #tpu.pipeline_mode<synchronous>, transform_indices = @transform_5, window_bounds = array<i64: 1, 24>}, {pipeline_mode = #tpu.pipeline_mode<synchronous>, transform_indices = @transform_6, window_bounds = array<i64: 24, 24>}, {pipeline_mode = #tpu.pipeline_mode<synchronous>, transform_indices = @transform_7, window_bounds = array<i64: 1, 24>}, {pipeline_mode = #tpu.pipeline_mode<synchronous>, transform_indices = @transform_8, window_bounds = array<i64: 24, 24>}, {pipeline_mode = #tpu.pipeline_mode<synchronous>, transform_indices = @transform_9, window_bounds = array<i64: 1, 24>}, {pipeline_mode = #tpu.pipeline_mode<synchronous>, transform_indices = @transform_10, window_bounds = array<i64: 24, 24>}, {pipeline_mode = #tpu.pipeline_mode<synchronous>, transform_indices = @transform_11, window_bounds = array<i64: 1, 24>}, {pipeline_mode = #tpu.pipeline_mode<synchronous>, transform_indices = @transform_12, window_bounds = array<i64: 24, 6>}, {pipeline_mode = #tpu.pipeline_mode<synchronous>, transform_indices = @transform_13, window_bounds = array<i64: 1, 6>}, {pipeline_mode = #tpu.pipeline_mode<synchronous>, transform_indices = @transform_14, window_bounds = array<i64: 3, 207>}, {pipeline_mode = #tpu.pipeline_mode<synchronous>, transform_indices = @transform_15, window_bounds = array<i64: 1, 207>}, {pipeline_mode = #tpu.pipeline_mode<synchronous>, transform_indices = @transform_16, window_bounds = array<i64: 1, 207>}, {transform_indices = @transform_17, window_bounds = array<i64: 8, 2>}]} {
    %c0 = arith.constant 0 : index
    %c0_0 = arith.constant 0 : index
    %0 = vector.load %arg1[%c0, %c0_0] : memref<8x207xf32, #tpu.memory_space<vmem>>, vector<8x207xf32>
    %c0_1 = arith.constant 0 : index
    %c0_2 = arith.constant 0 : index
    %1 = vector.load %arg2[%c0_1, %c0_2] : memref<8x1xf32, #tpu.memory_space<vmem>>, vector<8x1xf32>
    %c0_3 = arith.constant 0 : index
    %c0_4 = arith.constant 0 : index
    %2 = vector.load %arg3[%c0_3, %c0_4] : memref<8x3xf32, #tpu.memory_space<vmem>>, vector<8x3xf32>
    %c0_5 = arith.constant 0 : index
    %c0_6 = arith.constant 0 : index
    %3 = vector.load %arg4[%c0_5, %c0_6] : memref<8x207xf32, #tpu.memory_space<vmem>>, vector<8x207xf32>
    %c0_7 = arith.constant 0 : index
    %c0_8 = arith.constant 0 : index
    %4 = vector.load %arg5[%c0_7, %c0_8] : memref<207x24xf32, #tpu.memory_space<vmem>>, vector<207x24xf32>
    %cst = arith.constant dense<0.000000e+00> : vector<8x24xf32>
    %5 = tpu.matmul %0, %4, %cst {dimension_numbers = #tpu.dot_dimension_numbers<[1], [0], [0], [1], [0, 0, 1, 1], [], []>} : vector<8x207xf32>, vector<207x24xf32>, vector<8x24xf32> -> vector<8x24xf32>
    %c0_9 = arith.constant 0 : index
    %c0_10 = arith.constant 0 : index
    %6 = vector.load %arg6[%c0_9, %c0_10] : memref<1x24xf32, #tpu.memory_space<vmem>>, vector<1x24xf32>
    %7 = vector.broadcast %6 : vector<1x24xf32> to vector<8x24xf32>
    %8 = arith.addf %5, %7 : vector<8x24xf32>
    %cst_11 = arith.constant 0.000000e+00 : f32
    %9 = vector.broadcast %cst_11 : f32 to vector<8x24xf32>
    %10 = arith.maximumf %8, %9 : vector<8x24xf32>
    %c0_12 = arith.constant 0 : index
    %c0_13 = arith.constant 0 : index
    %11 = vector.load %arg7[%c0_12, %c0_13] : memref<24x24xf32, #tpu.memory_space<vmem>>, vector<24x24xf32>
    %cst_14 = arith.constant dense<0.000000e+00> : vector<8x24xf32>
    %12 = tpu.matmul %10, %11, %cst_14 {dimension_numbers = #tpu.dot_dimension_numbers<[1], [0], [0], [1], [0, 0, 1, 1], [], []>} : vector<8x24xf32>, vector<24x24xf32>, vector<8x24xf32> -> vector<8x24xf32>
    %c0_15 = arith.constant 0 : index
    %c0_16 = arith.constant 0 : index
    %13 = vector.load %arg8[%c0_15, %c0_16] : memref<1x24xf32, #tpu.memory_space<vmem>>, vector<1x24xf32>
    %14 = vector.broadcast %13 : vector<1x24xf32> to vector<8x24xf32>
    %15 = arith.addf %12, %14 : vector<8x24xf32>
    %cst_17 = arith.constant 0.000000e+00 : f32
    %16 = vector.broadcast %cst_17 : f32 to vector<8x24xf32>
    %17 = arith.maximumf %15, %16 : vector<8x24xf32>
    %c0_18 = arith.constant 0 : index
    %c0_19 = arith.constant 0 : index
    %18 = vector.load %arg9[%c0_18, %c0_19] : memref<24x24xf32, #tpu.memory_space<vmem>>, vector<24x24xf32>
    %cst_20 = arith.constant dense<0.000000e+00> : vector<8x24xf32>
    %19 = tpu.matmul %17, %18, %cst_20 {dimension_numbers = #tpu.dot_dimension_numbers<[1], [0], [0], [1], [0, 0, 1, 1], [], []>} : vector<8x24xf32>, vector<24x24xf32>, vector<8x24xf32> -> vector<8x24xf32>
    %c0_21 = arith.constant 0 : index
    %c0_22 = arith.constant 0 : index
    %20 = vector.load %arg10[%c0_21, %c0_22] : memref<1x24xf32, #tpu.memory_space<vmem>>, vector<1x24xf32>
    %21 = vector.broadcast %20 : vector<1x24xf32> to vector<8x24xf32>
    %22 = arith.addf %19, %21 : vector<8x24xf32>
    %cst_23 = arith.constant 0.000000e+00 : f32
    %23 = vector.broadcast %cst_23 : f32 to vector<8x24xf32>
    %24 = arith.maximumf %22, %23 : vector<8x24xf32>
    %c0_24 = arith.constant 0 : index
    %c0_25 = arith.constant 0 : index
    %25 = vector.load %arg11[%c0_24, %c0_25] : memref<24x24xf32, #tpu.memory_space<vmem>>, vector<24x24xf32>
    %cst_26 = arith.constant dense<0.000000e+00> : vector<8x24xf32>
    %26 = tpu.matmul %24, %25, %cst_26 {dimension_numbers = #tpu.dot_dimension_numbers<[1], [0], [0], [1], [0, 0, 1, 1], [], []>} : vector<8x24xf32>, vector<24x24xf32>, vector<8x24xf32> -> vector<8x24xf32>
    %c0_27 = arith.constant 0 : index
    %c0_28 = arith.constant 0 : index
    %27 = vector.load %arg12[%c0_27, %c0_28] : memref<1x24xf32, #tpu.memory_space<vmem>>, vector<1x24xf32>
    %28 = vector.broadcast %27 : vector<1x24xf32> to vector<8x24xf32>
    %29 = arith.addf %26, %28 : vector<8x24xf32>
    %cst_29 = arith.constant 0.000000e+00 : f32
    %30 = vector.broadcast %cst_29 : f32 to vector<8x24xf32>
    %31 = arith.maximumf %29, %30 : vector<8x24xf32>
    %c0_30 = arith.constant 0 : index
    %c0_31 = arith.constant 0 : index
    %32 = vector.load %arg13[%c0_30, %c0_31] : memref<24x6xf32, #tpu.memory_space<vmem>>, vector<24x6xf32>
    %cst_32 = arith.constant dense<0.000000e+00> : vector<8x6xf32>
    %33 = tpu.matmul %31, %32, %cst_32 {dimension_numbers = #tpu.dot_dimension_numbers<[1], [0], [0], [1], [0, 0, 1, 1], [], []>} : vector<8x24xf32>, vector<24x6xf32>, vector<8x6xf32> -> vector<8x6xf32>
    %c0_33 = arith.constant 0 : index
    %c0_34 = arith.constant 0 : index
    %34 = vector.load %arg14[%c0_33, %c0_34] : memref<1x6xf32, #tpu.memory_space<vmem>>, vector<1x6xf32>
    %35 = vector.broadcast %34 : vector<1x6xf32> to vector<8x6xf32>
    %36 = arith.addf %33, %35 : vector<8x6xf32>
    %37 = math.exp %36 : vector<8x6xf32>
    %38 = vector.extract_strided_slice %36 {offsets = [0, 1], sizes = [8, 1], strides = [1, 1]} : vector<8x6xf32> to vector<8x1xf32>
    %39 = vector.extract_strided_slice %36 {offsets = [0, 3], sizes = [8, 1], strides = [1, 1]} : vector<8x6xf32> to vector<8x1xf32>
    %40 = vector.extract_strided_slice %36 {offsets = [0, 5], sizes = [8, 1], strides = [1, 1]} : vector<8x6xf32> to vector<8x1xf32>
    %41 = vector.extract_strided_slice %37 {offsets = [0, 0], sizes = [8, 1], strides = [1, 1]} : vector<8x6xf32> to vector<8x1xf32>
    %42 = vector.extract_strided_slice %37 {offsets = [0, 1], sizes = [8, 1], strides = [1, 1]} : vector<8x6xf32> to vector<8x1xf32>
    %43 = vector.extract_strided_slice %36 {offsets = [0, 2], sizes = [8, 1], strides = [1, 1]} : vector<8x6xf32> to vector<8x1xf32>
    %44 = vector.extract_strided_slice %37 {offsets = [0, 3], sizes = [8, 1], strides = [1, 1]} : vector<8x6xf32> to vector<8x1xf32>
    %45 = vector.extract_strided_slice %36 {offsets = [0, 4], sizes = [8, 1], strides = [1, 1]} : vector<8x6xf32> to vector<8x1xf32>
    %46 = vector.extract_strided_slice %37 {offsets = [0, 5], sizes = [8, 1], strides = [1, 1]} : vector<8x6xf32> to vector<8x1xf32>
    %47 = vector.extract_strided_slice %2 {offsets = [0, 0], sizes = [8, 1], strides = [1, 1]} : vector<8x3xf32> to vector<8x1xf32>
    %48 = arith.mulf %42, %47 : vector<8x1xf32>
    %49 = arith.addf %41, %48 : vector<8x1xf32>
    %50 = vector.extract_strided_slice %2 {offsets = [0, 1], sizes = [8, 1], strides = [1, 1]} : vector<8x3xf32> to vector<8x1xf32>
    %51 = arith.mulf %44, %50 : vector<8x1xf32>
    %52 = arith.addf %43, %51 : vector<8x1xf32>
    %53 = vector.extract_strided_slice %2 {offsets = [0, 2], sizes = [8, 1], strides = [1, 1]} : vector<8x3xf32> to vector<8x1xf32>
    %54 = arith.mulf %46, %53 : vector<8x1xf32>
    %55 = arith.addf %45, %54 : vector<8x1xf32>
    %56 = math.cos %52 : vector<8x1xf32>
    %57 = arith.mulf %49, %56 : vector<8x1xf32>
    %c0_35 = arith.constant 0 : index
    %c0_36 = arith.constant 0 : index
    %58 = vector.load %arg15[%c0_35, %c0_36] : memref<3x207xf32, #tpu.memory_space<vmem>>, vector<1x207xf32>
    %59 = vector.broadcast %57 : vector<8x1xf32> to vector<8x207xf32>
    %60 = vector.broadcast %58 : vector<1x207xf32> to vector<8x207xf32>
    %61 = arith.mulf %59, %60 : vector<8x207xf32>
    %62 = math.sin %52 : vector<8x1xf32>
    %63 = arith.mulf %49, %62 : vector<8x1xf32>
    %c1 = arith.constant 1 : index
    %c0_37 = arith.constant 0 : index
    %64 = vector.load %arg15[%c1, %c0_37] : memref<3x207xf32, #tpu.memory_space<vmem>>, vector<1x207xf32>
    %65 = vector.broadcast %63 : vector<8x1xf32> to vector<8x207xf32>
    %66 = vector.broadcast %64 : vector<1x207xf32> to vector<8x207xf32>
    %67 = arith.mulf %65, %66 : vector<8x207xf32>
    %68 = arith.addf %61, %67 : vector<8x207xf32>
    %c2 = arith.constant 2 : index
    %c0_38 = arith.constant 0 : index
    %69 = vector.load %arg15[%c2, %c0_38] : memref<3x207xf32, #tpu.memory_space<vmem>>, vector<1x207xf32>
    %70 = vector.broadcast %55 : vector<8x1xf32> to vector<8x207xf32>
    %71 = vector.broadcast %69 : vector<1x207xf32> to vector<8x207xf32>
    %72 = arith.mulf %70, %71 : vector<8x207xf32>
    %73 = arith.addf %68, %72 : vector<8x207xf32>
    %cst_39 = arith.constant -3.000000e+01 : f32
    %cst_40 = arith.constant 3.000000e+01 : f32
    %74 = vector.broadcast %cst_39 : f32 to vector<8x207xf32>
    %75 = arith.maximumf %74, %73 : vector<8x207xf32>
    %76 = vector.broadcast %cst_40 : f32 to vector<8x207xf32>
    %77 = arith.minimumf %76, %75 : vector<8x207xf32>
    %cst_41 = arith.constant 0.000000e+00 : f32
    %78 = vector.broadcast %cst_41 : f32 to vector<8x207xf32>
    %79 = arith.subf %78, %77 : vector<8x207xf32>
    %80 = math.exp %79 : vector<8x207xf32>
    %cst_42 = arith.constant 1.000000e+00 : f32
    %81 = vector.broadcast %cst_42 : f32 to vector<8x207xf32>
    %82 = arith.addf %81, %80 : vector<8x207xf32>
    %83 = tpu.reciprocal %82 {approx = true} : vector<8x207xf32> -> vector<8x207xf32>
    %84 = arith.mulf %82, %83 : vector<8x207xf32>
    %cst_43 = arith.constant 2.000000e+00 : f32
    %85 = vector.broadcast %cst_43 : f32 to vector<8x207xf32>
    %86 = arith.subf %85, %84 : vector<8x207xf32>
    %87 = arith.mulf %83, %86 : vector<8x207xf32>
    %cst_44 = arith.constant 9.99999996E-13 : f32
    %88 = vector.broadcast %cst_44 : f32 to vector<8x207xf32>
    %89 = arith.maximumf %87, %88 : vector<8x207xf32>
    %90 = arith.mulf %80, %87 : vector<8x207xf32>
    %cst_45 = arith.constant 9.99999996E-13 : f32
    %91 = vector.broadcast %cst_45 : f32 to vector<8x207xf32>
    %92 = arith.maximumf %90, %91 : vector<8x207xf32>
    %c0_46 = arith.constant 0 : index
    %c0_47 = arith.constant 0 : index
    %93 = vector.load %arg16[%c0_46, %c0_47] : memref<1x207xf32, #tpu.memory_space<vmem>>, vector<1x207xf32>
    %94 = vector.broadcast %93 : vector<1x207xf32> to vector<8x207xf32>
    %95 = arith.mulf %89, %94 : vector<8x207xf32>
    %96 = vector.broadcast %93 : vector<1x207xf32> to vector<8x207xf32>
    %97 = arith.mulf %92, %96 : vector<8x207xf32>
    %98 = arith.addf %0, %95 : vector<8x207xf32>
    %cst_48 = arith.constant 1.000000e+00 : f32
    %99 = vector.broadcast %cst_48 : f32 to vector<8x207xf32>
    %100 = arith.mulf %99, %98 : vector<8x207xf32>
    %cst_49 = arith.constant 33.4583321 : f32
    %101 = vector.broadcast %cst_49 : f32 to vector<8x207xf32>
    %102 = arith.addf %100, %101 : vector<8x207xf32>
    %103 = arith.mulf %102, %98 : vector<8x207xf32>
    %cst_50 = arith.constant 466.334198 : f32
    %104 = vector.broadcast %cst_50 : f32 to vector<8x207xf32>
    %105 = arith.addf %103, %104 : vector<8x207xf32>
    %106 = arith.mulf %105, %98 : vector<8x207xf32>
    %cst_51 = arith.constant 3465.70947 : f32
    %107 = vector.broadcast %cst_51 : f32 to vector<8x207xf32>
    %108 = arith.addf %106, %107 : vector<8x207xf32>
    %109 = arith.mulf %108, %98 : vector<8x207xf32>
    %cst_52 = arith.constant 14484.9141 : f32
    %110 = vector.broadcast %cst_52 : f32 to vector<8x207xf32>
    %111 = arith.addf %109, %110 : vector<8x207xf32>
    %112 = arith.mulf %111, %98 : vector<8x207xf32>
    %cst_53 = arith.constant 32281.0645 : f32
    %113 = vector.broadcast %cst_53 : f32 to vector<8x207xf32>
    %114 = arith.addf %112, %113 : vector<8x207xf32>
    %115 = arith.mulf %114, %98 : vector<8x207xf32>
    %cst_54 = arith.constant 29969.5938 : f32
    %116 = vector.broadcast %cst_54 : f32 to vector<8x207xf32>
    %117 = arith.addf %115, %116 : vector<8x207xf32>
    %cst_55 = arith.constant 7.000000e+00 : f32
    %118 = vector.broadcast %cst_55 : f32 to vector<8x207xf32>
    %119 = arith.addf %98, %118 : vector<8x207xf32>
    %120 = arith.mulf %98, %119 : vector<8x207xf32>
    %cst_56 = arith.constant 6.000000e+00 : f32
    %121 = vector.broadcast %cst_56 : f32 to vector<8x207xf32>
    %122 = arith.addf %120, %121 : vector<8x207xf32>
    %123 = arith.mulf %98, %122 : vector<8x207xf32>
    %cst_57 = arith.constant 1.000000e+01 : f32
    %124 = vector.broadcast %cst_57 : f32 to vector<8x207xf32>
    %125 = arith.addf %120, %124 : vector<8x207xf32>
    %126 = arith.mulf %123, %125 : vector<8x207xf32>
    %cst_58 = arith.constant 1.200000e+01 : f32
    %127 = vector.broadcast %cst_58 : f32 to vector<8x207xf32>
    %128 = arith.addf %120, %127 : vector<8x207xf32>
    %129 = arith.mulf %126, %128 : vector<8x207xf32>
    %cst_59 = arith.constant 5.000000e-01 : f32
    %130 = vector.broadcast %cst_59 : f32 to vector<8x207xf32>
    %131 = arith.addf %98, %130 : vector<8x207xf32>
    %cst_60 = arith.constant 5.500000e+00 : f32
    %132 = vector.broadcast %cst_60 : f32 to vector<8x207xf32>
    %133 = arith.addf %98, %132 : vector<8x207xf32>
    %134 = math.log %133 : vector<8x207xf32>
    %135 = arith.mulf %131, %134 : vector<8x207xf32>
    %136 = vector.broadcast %1 : vector<8x1xf32> to vector<8x207xf32>
    %137 = arith.subf %136, %0 : vector<8x207xf32>
    %138 = arith.addf %137, %97 : vector<8x207xf32>
    %cst_61 = arith.constant 1.000000e+00 : f32
    %139 = vector.broadcast %cst_61 : f32 to vector<8x207xf32>
    %140 = arith.mulf %139, %138 : vector<8x207xf32>
    %cst_62 = arith.constant 33.4583321 : f32
    %141 = vector.broadcast %cst_62 : f32 to vector<8x207xf32>
    %142 = arith.addf %140, %141 : vector<8x207xf32>
    %143 = arith.mulf %142, %138 : vector<8x207xf32>
    %cst_63 = arith.constant 466.334198 : f32
    %144 = vector.broadcast %cst_63 : f32 to vector<8x207xf32>
    %145 = arith.addf %143, %144 : vector<8x207xf32>
    %146 = arith.mulf %145, %138 : vector<8x207xf32>
    %cst_64 = arith.constant 3465.70947 : f32
    %147 = vector.broadcast %cst_64 : f32 to vector<8x207xf32>
    %148 = arith.addf %146, %147 : vector<8x207xf32>
    %149 = arith.mulf %148, %138 : vector<8x207xf32>
    %cst_65 = arith.constant 14484.9141 : f32
    %150 = vector.broadcast %cst_65 : f32 to vector<8x207xf32>
    %151 = arith.addf %149, %150 : vector<8x207xf32>
    %152 = arith.mulf %151, %138 : vector<8x207xf32>
    %cst_66 = arith.constant 32281.0645 : f32
    %153 = vector.broadcast %cst_66 : f32 to vector<8x207xf32>
    %154 = arith.addf %152, %153 : vector<8x207xf32>
    %155 = arith.mulf %154, %138 : vector<8x207xf32>
    %cst_67 = arith.constant 29969.5938 : f32
    %156 = vector.broadcast %cst_67 : f32 to vector<8x207xf32>
    %157 = arith.addf %155, %156 : vector<8x207xf32>
    %cst_68 = arith.constant 7.000000e+00 : f32
    %158 = vector.broadcast %cst_68 : f32 to vector<8x207xf32>
    %159 = arith.addf %138, %158 : vector<8x207xf32>
    %160 = arith.mulf %138, %159 : vector<8x207xf32>
    %cst_69 = arith.constant 6.000000e+00 : f32
    %161 = vector.broadcast %cst_69 : f32 to vector<8x207xf32>
    %162 = arith.addf %160, %161 : vector<8x207xf32>
    %163 = arith.mulf %138, %162 : vector<8x207xf32>
    %cst_70 = arith.constant 1.000000e+01 : f32
    %164 = vector.broadcast %cst_70 : f32 to vector<8x207xf32>
    %165 = arith.addf %160, %164 : vector<8x207xf32>
    %166 = arith.mulf %163, %165 : vector<8x207xf32>
    %cst_71 = arith.constant 1.200000e+01 : f32
    %167 = vector.broadcast %cst_71 : f32 to vector<8x207xf32>
    %168 = arith.addf %160, %167 : vector<8x207xf32>
    %169 = arith.mulf %166, %168 : vector<8x207xf32>
    %cst_72 = arith.constant 5.000000e-01 : f32
    %170 = vector.broadcast %cst_72 : f32 to vector<8x207xf32>
    %171 = arith.addf %138, %170 : vector<8x207xf32>
    %cst_73 = arith.constant 5.500000e+00 : f32
    %172 = vector.broadcast %cst_73 : f32 to vector<8x207xf32>
    %173 = arith.addf %138, %172 : vector<8x207xf32>
    %174 = math.log %173 : vector<8x207xf32>
    %175 = arith.mulf %171, %174 : vector<8x207xf32>
    %176 = vector.broadcast %1 : vector<8x1xf32> to vector<8x207xf32>
    %177 = vector.broadcast %93 : vector<1x207xf32> to vector<8x207xf32>
    %178 = arith.addf %176, %177 : vector<8x207xf32>
    %cst_74 = arith.constant 1.000000e+00 : f32
    %179 = vector.broadcast %cst_74 : f32 to vector<8x207xf32>
    %180 = arith.mulf %179, %178 : vector<8x207xf32>
    %cst_75 = arith.constant 33.4583321 : f32
    %181 = vector.broadcast %cst_75 : f32 to vector<8x207xf32>
    %182 = arith.addf %180, %181 : vector<8x207xf32>
    %183 = arith.mulf %182, %178 : vector<8x207xf32>
    %cst_76 = arith.constant 466.334198 : f32
    %184 = vector.broadcast %cst_76 : f32 to vector<8x207xf32>
    %185 = arith.addf %183, %184 : vector<8x207xf32>
    %186 = arith.mulf %185, %178 : vector<8x207xf32>
    %cst_77 = arith.constant 3465.70947 : f32
    %187 = vector.broadcast %cst_77 : f32 to vector<8x207xf32>
    %188 = arith.addf %186, %187 : vector<8x207xf32>
    %189 = arith.mulf %188, %178 : vector<8x207xf32>
    %cst_78 = arith.constant 14484.9141 : f32
    %190 = vector.broadcast %cst_78 : f32 to vector<8x207xf32>
    %191 = arith.addf %189, %190 : vector<8x207xf32>
    %192 = arith.mulf %191, %178 : vector<8x207xf32>
    %cst_79 = arith.constant 32281.0645 : f32
    %193 = vector.broadcast %cst_79 : f32 to vector<8x207xf32>
    %194 = arith.addf %192, %193 : vector<8x207xf32>
    %195 = arith.mulf %194, %178 : vector<8x207xf32>
    %cst_80 = arith.constant 29969.5938 : f32
    %196 = vector.broadcast %cst_80 : f32 to vector<8x207xf32>
    %197 = arith.addf %195, %196 : vector<8x207xf32>
    %cst_81 = arith.constant 7.000000e+00 : f32
    %198 = vector.broadcast %cst_81 : f32 to vector<8x207xf32>
    %199 = arith.addf %178, %198 : vector<8x207xf32>
    %200 = arith.mulf %178, %199 : vector<8x207xf32>
    %cst_82 = arith.constant 6.000000e+00 : f32
    %201 = vector.broadcast %cst_82 : f32 to vector<8x207xf32>
    %202 = arith.addf %200, %201 : vector<8x207xf32>
    %203 = arith.mulf %178, %202 : vector<8x207xf32>
    %cst_83 = arith.constant 1.000000e+01 : f32
    %204 = vector.broadcast %cst_83 : f32 to vector<8x207xf32>
    %205 = arith.addf %200, %204 : vector<8x207xf32>
    %206 = arith.mulf %203, %205 : vector<8x207xf32>
    %cst_84 = arith.constant 1.200000e+01 : f32
    %207 = vector.broadcast %cst_84 : f32 to vector<8x207xf32>
    %208 = arith.addf %200, %207 : vector<8x207xf32>
    %209 = arith.mulf %206, %208 : vector<8x207xf32>
    %cst_85 = arith.constant 5.000000e-01 : f32
    %210 = vector.broadcast %cst_85 : f32 to vector<8x207xf32>
    %211 = arith.addf %178, %210 : vector<8x207xf32>
    %cst_86 = arith.constant 5.500000e+00 : f32
    %212 = vector.broadcast %cst_86 : f32 to vector<8x207xf32>
    %213 = arith.addf %178, %212 : vector<8x207xf32>
    %214 = math.log %213 : vector<8x207xf32>
    %215 = arith.mulf %211, %214 : vector<8x207xf32>
    %cst_87 = arith.constant 1.000000e+00 : f32
    %216 = vector.broadcast %cst_87 : f32 to vector<8x207xf32>
    %217 = arith.mulf %216, %95 : vector<8x207xf32>
    %cst_88 = arith.constant 33.4583321 : f32
    %218 = vector.broadcast %cst_88 : f32 to vector<8x207xf32>
    %219 = arith.addf %217, %218 : vector<8x207xf32>
    %220 = arith.mulf %219, %95 : vector<8x207xf32>
    %cst_89 = arith.constant 466.334198 : f32
    %221 = vector.broadcast %cst_89 : f32 to vector<8x207xf32>
    %222 = arith.addf %220, %221 : vector<8x207xf32>
    %223 = arith.mulf %222, %95 : vector<8x207xf32>
    %cst_90 = arith.constant 3465.70947 : f32
    %224 = vector.broadcast %cst_90 : f32 to vector<8x207xf32>
    %225 = arith.addf %223, %224 : vector<8x207xf32>
    %226 = arith.mulf %225, %95 : vector<8x207xf32>
    %cst_91 = arith.constant 14484.9141 : f32
    %227 = vector.broadcast %cst_91 : f32 to vector<8x207xf32>
    %228 = arith.addf %226, %227 : vector<8x207xf32>
    %229 = arith.mulf %228, %95 : vector<8x207xf32>
    %cst_92 = arith.constant 32281.0645 : f32
    %230 = vector.broadcast %cst_92 : f32 to vector<8x207xf32>
    %231 = arith.addf %229, %230 : vector<8x207xf32>
    %232 = arith.mulf %231, %95 : vector<8x207xf32>
    %cst_93 = arith.constant 29969.5938 : f32
    %233 = vector.broadcast %cst_93 : f32 to vector<8x207xf32>
    %234 = arith.addf %232, %233 : vector<8x207xf32>
    %cst_94 = arith.constant 7.000000e+00 : f32
    %235 = vector.broadcast %cst_94 : f32 to vector<8x207xf32>
    %236 = arith.addf %95, %235 : vector<8x207xf32>
    %237 = arith.mulf %95, %236 : vector<8x207xf32>
    %cst_95 = arith.constant 6.000000e+00 : f32
    %238 = vector.broadcast %cst_95 : f32 to vector<8x207xf32>
    %239 = arith.addf %237, %238 : vector<8x207xf32>
    %240 = arith.mulf %95, %239 : vector<8x207xf32>
    %cst_96 = arith.constant 1.000000e+01 : f32
    %241 = vector.broadcast %cst_96 : f32 to vector<8x207xf32>
    %242 = arith.addf %237, %241 : vector<8x207xf32>
    %243 = arith.mulf %240, %242 : vector<8x207xf32>
    %cst_97 = arith.constant 1.200000e+01 : f32
    %244 = vector.broadcast %cst_97 : f32 to vector<8x207xf32>
    %245 = arith.addf %237, %244 : vector<8x207xf32>
    %246 = arith.mulf %243, %245 : vector<8x207xf32>
    %cst_98 = arith.constant 5.000000e-01 : f32
    %247 = vector.broadcast %cst_98 : f32 to vector<8x207xf32>
    %248 = arith.addf %95, %247 : vector<8x207xf32>
    %cst_99 = arith.constant 5.500000e+00 : f32
    %249 = vector.broadcast %cst_99 : f32 to vector<8x207xf32>
    %250 = arith.addf %95, %249 : vector<8x207xf32>
    %251 = math.log %250 : vector<8x207xf32>
    %252 = arith.mulf %248, %251 : vector<8x207xf32>
    %cst_100 = arith.constant 1.000000e+00 : f32
    %253 = vector.broadcast %cst_100 : f32 to vector<8x207xf32>
    %254 = arith.mulf %253, %97 : vector<8x207xf32>
    %cst_101 = arith.constant 33.4583321 : f32
    %255 = vector.broadcast %cst_101 : f32 to vector<8x207xf32>
    %256 = arith.addf %254, %255 : vector<8x207xf32>
    %257 = arith.mulf %256, %97 : vector<8x207xf32>
    %cst_102 = arith.constant 466.334198 : f32
    %258 = vector.broadcast %cst_102 : f32 to vector<8x207xf32>
    %259 = arith.addf %257, %258 : vector<8x207xf32>
    %260 = arith.mulf %259, %97 : vector<8x207xf32>
    %cst_103 = arith.constant 3465.70947 : f32
    %261 = vector.broadcast %cst_103 : f32 to vector<8x207xf32>
    %262 = arith.addf %260, %261 : vector<8x207xf32>
    %263 = arith.mulf %262, %97 : vector<8x207xf32>
    %cst_104 = arith.constant 14484.9141 : f32
    %264 = vector.broadcast %cst_104 : f32 to vector<8x207xf32>
    %265 = arith.addf %263, %264 : vector<8x207xf32>
    %266 = arith.mulf %265, %97 : vector<8x207xf32>
    %cst_105 = arith.constant 32281.0645 : f32
    %267 = vector.broadcast %cst_105 : f32 to vector<8x207xf32>
    %268 = arith.addf %266, %267 : vector<8x207xf32>
    %269 = arith.mulf %268, %97 : vector<8x207xf32>
    %cst_106 = arith.constant 29969.5938 : f32
    %270 = vector.broadcast %cst_106 : f32 to vector<8x207xf32>
    %271 = arith.addf %269, %270 : vector<8x207xf32>
    %cst_107 = arith.constant 7.000000e+00 : f32
    %272 = vector.broadcast %cst_107 : f32 to vector<8x207xf32>
    %273 = arith.addf %97, %272 : vector<8x207xf32>
    %274 = arith.mulf %97, %273 : vector<8x207xf32>
    %cst_108 = arith.constant 6.000000e+00 : f32
    %275 = vector.broadcast %cst_108 : f32 to vector<8x207xf32>
    %276 = arith.addf %274, %275 : vector<8x207xf32>
    %277 = arith.mulf %97, %276 : vector<8x207xf32>
    %cst_109 = arith.constant 1.000000e+01 : f32
    %278 = vector.broadcast %cst_109 : f32 to vector<8x207xf32>
    %279 = arith.addf %274, %278 : vector<8x207xf32>
    %280 = arith.mulf %277, %279 : vector<8x207xf32>
    %cst_110 = arith.constant 1.200000e+01 : f32
    %281 = vector.broadcast %cst_110 : f32 to vector<8x207xf32>
    %282 = arith.addf %274, %281 : vector<8x207xf32>
    %283 = arith.mulf %280, %282 : vector<8x207xf32>
    %cst_111 = arith.constant 5.000000e-01 : f32
    %284 = vector.broadcast %cst_111 : f32 to vector<8x207xf32>
    %285 = arith.addf %97, %284 : vector<8x207xf32>
    %cst_112 = arith.constant 5.500000e+00 : f32
    %286 = vector.broadcast %cst_112 : f32 to vector<8x207xf32>
    %287 = arith.addf %97, %286 : vector<8x207xf32>
    %288 = math.log %287 : vector<8x207xf32>
    %289 = arith.mulf %285, %288 : vector<8x207xf32>
    %290 = arith.addf %135, %175 : vector<8x207xf32>
    %291 = arith.addf %215, %252 : vector<8x207xf32>
    %292 = arith.addf %291, %289 : vector<8x207xf32>
    %293 = arith.subf %290, %292 : vector<8x207xf32>
    %294 = arith.mulf %117, %246 : vector<8x207xf32>
    %295 = math.log %294 : vector<8x207xf32>
    %296 = arith.mulf %129, %234 : vector<8x207xf32>
    %297 = math.log %296 : vector<8x207xf32>
    %298 = arith.subf %295, %297 : vector<8x207xf32>
    %299 = arith.mulf %157, %283 : vector<8x207xf32>
    %300 = math.log %299 : vector<8x207xf32>
    %301 = arith.addf %298, %300 : vector<8x207xf32>
    %302 = arith.mulf %169, %271 : vector<8x207xf32>
    %303 = math.log %302 : vector<8x207xf32>
    %304 = arith.subf %301, %303 : vector<8x207xf32>
    %305 = math.log %209 : vector<8x207xf32>
    %306 = arith.addf %304, %305 : vector<8x207xf32>
    %307 = math.log %197 : vector<8x207xf32>
    %308 = arith.subf %306, %307 : vector<8x207xf32>
    %c0_113 = arith.constant 0 : index
    %c0_114 = arith.constant 0 : index
    %309 = vector.load %arg17[%c0_113, %c0_114] : memref<1x207xf32, #tpu.memory_space<vmem>>, vector<1x207xf32>
    %310 = vector.broadcast %309 : vector<1x207xf32> to vector<8x207xf32>
    %311 = arith.addf %3, %310 : vector<8x207xf32>
    %312 = arith.addf %311, %293 : vector<8x207xf32>
    %313 = arith.addf %312, %308 : vector<8x207xf32>
    %cst_115 = arith.constant dense<0.000000e+00> : vector<8xf32>
    %314 = vector.multi_reduction <add>, %313, %cst_115 [1] : vector<8x207xf32> to vector<8xf32>
    %315 = vector.shape_cast %314 : vector<8xf32> to vector<8x1xf32>
    %cst_116 = arith.constant -2.30258512 : f32
    %316 = vector.broadcast %cst_116 : f32 to vector<8x1xf32>
    %317 = arith.subf %316, %38 : vector<8x1xf32>
    %318 = arith.mulf %42, %42 : vector<8x1xf32>
    %cst_117 = arith.constant 1.000000e+00 : f32
    %319 = vector.broadcast %cst_117 : f32 to vector<8x1xf32>
    %320 = arith.subf %41, %319 : vector<8x1xf32>
    %321 = arith.mulf %320, %320 : vector<8x1xf32>
    %322 = arith.addf %318, %321 : vector<8x1xf32>
    %cst_118 = arith.constant 5.000000e+01 : f32
    %323 = vector.broadcast %cst_118 : f32 to vector<8x1xf32>
    %324 = arith.mulf %322, %323 : vector<8x1xf32>
    %325 = arith.addf %317, %324 : vector<8x1xf32>
    %cst_119 = arith.constant 5.000000e-01 : f32
    %326 = vector.broadcast %cst_119 : f32 to vector<8x1xf32>
    %327 = arith.subf %325, %326 : vector<8x1xf32>
    %cst_120 = arith.constant 2.53102422 : f32
    %328 = vector.broadcast %cst_120 : f32 to vector<8x1xf32>
    %329 = arith.subf %328, %39 : vector<8x1xf32>
    %330 = arith.mulf %44, %44 : vector<8x1xf32>
    %cst_121 = arith.constant 3.14159274 : f32
    %331 = vector.broadcast %cst_121 : f32 to vector<8x1xf32>
    %332 = arith.subf %43, %331 : vector<8x1xf32>
    %333 = arith.mulf %332, %332 : vector<8x1xf32>
    %334 = arith.addf %330, %333 : vector<8x1xf32>
    %cst_122 = arith.constant 0.00316628697 : f32
    %335 = vector.broadcast %cst_122 : f32 to vector<8x1xf32>
    %336 = arith.mulf %334, %335 : vector<8x1xf32>
    %337 = arith.addf %329, %336 : vector<8x1xf32>
    %cst_123 = arith.constant 5.000000e-01 : f32
    %338 = vector.broadcast %cst_123 : f32 to vector<8x1xf32>
    %339 = arith.subf %337, %338 : vector<8x1xf32>
    %cst_124 = arith.constant -0.693147182 : f32
    %340 = vector.broadcast %cst_124 : f32 to vector<8x1xf32>
    %341 = arith.subf %340, %40 : vector<8x1xf32>
    %342 = arith.mulf %46, %46 : vector<8x1xf32>
    %cst_125 = arith.constant 5.000000e+00 : f32
    %343 = vector.broadcast %cst_125 : f32 to vector<8x1xf32>
    %344 = arith.addf %45, %343 : vector<8x1xf32>
    %345 = arith.mulf %344, %344 : vector<8x1xf32>
    %346 = arith.addf %342, %345 : vector<8x1xf32>
    %cst_126 = arith.constant 2.000000e+00 : f32
    %347 = vector.broadcast %cst_126 : f32 to vector<8x1xf32>
    %348 = arith.mulf %346, %347 : vector<8x1xf32>
    %349 = arith.addf %341, %348 : vector<8x1xf32>
    %cst_127 = arith.constant 5.000000e-01 : f32
    %350 = vector.broadcast %cst_127 : f32 to vector<8x1xf32>
    %351 = arith.subf %349, %350 : vector<8x1xf32>
    %352 = arith.addf %327, %339 : vector<8x1xf32>
    %353 = arith.addf %352, %351 : vector<8x1xf32>
    %354 = tpu.concatenate %315, %353 in 1 : vector<8x1xf32>, vector<8x1xf32> -> vector<8x2xf32>
    %c0_128 = arith.constant 0 : index
    %c0_129 = arith.constant 0 : index
    %355 = vector.load %arg18[%c0_128, %c0_129] : memref<8x2xf32, #tpu.memory_space<vmem>>, vector<8x2xf32>
    tpu.vector_store %arg18[%c0_128, %c0_129], %354 {strides = array<i32>} : memref<8x2xf32, #tpu.memory_space<vmem>>, vector<8x2xf32>,
    return
  }
  func.func @transform_0(%arg0: i32) -> (i32, i32) {
    %c0_i32 = arith.constant 0 : i32
    %c0_i32_0 = arith.constant 0 : i32
    return %arg0, %c0_i32 : i32, i32
  }
  func.func @transform_1(%arg0: i32) -> (i32, i32) {
    %c0_i32 = arith.constant 0 : i32
    %c0_i32_0 = arith.constant 0 : i32
    return %arg0, %c0_i32 : i32, i32
  }
  func.func @transform_2(%arg0: i32) -> (i32, i32) {
    %c0_i32 = arith.constant 0 : i32
    %c0_i32_0 = arith.constant 0 : i32
    return %arg0, %c0_i32 : i32, i32
  }
  func.func @transform_3(%arg0: i32) -> (i32, i32) {
    %c0_i32 = arith.constant 0 : i32
    %c0_i32_0 = arith.constant 0 : i32
    return %arg0, %c0_i32 : i32, i32
  }
  func.func @transform_4(%arg0: i32) -> (i32, i32) {
    %c0_i32 = arith.constant 0 : i32
    %c0_i32_0 = arith.constant 0 : i32
    %c0_i32_1 = arith.constant 0 : i32
    return %c0_i32, %c0_i32_0 : i32, i32
  }
  func.func @transform_5(%arg0: i32) -> (i32, i32) {
    %c0_i32 = arith.constant 0 : i32
    %c0_i32_0 = arith.constant 0 : i32
    %c0_i32_1 = arith.constant 0 : i32
    return %c0_i32, %c0_i32_0 : i32, i32
  }
  func.func @transform_6(%arg0: i32) -> (i32, i32) {
    %c0_i32 = arith.constant 0 : i32
    %c0_i32_0 = arith.constant 0 : i32
    %c0_i32_1 = arith.constant 0 : i32
    return %c0_i32, %c0_i32_0 : i32, i32
  }
  func.func @transform_7(%arg0: i32) -> (i32, i32) {
    %c0_i32 = arith.constant 0 : i32
    %c0_i32_0 = arith.constant 0 : i32
    %c0_i32_1 = arith.constant 0 : i32
    return %c0_i32, %c0_i32_0 : i32, i32
  }
  func.func @transform_8(%arg0: i32) -> (i32, i32) {
    %c0_i32 = arith.constant 0 : i32
    %c0_i32_0 = arith.constant 0 : i32
    %c0_i32_1 = arith.constant 0 : i32
    return %c0_i32, %c0_i32_0 : i32, i32
  }
  func.func @transform_9(%arg0: i32) -> (i32, i32) {
    %c0_i32 = arith.constant 0 : i32
    %c0_i32_0 = arith.constant 0 : i32
    %c0_i32_1 = arith.constant 0 : i32
    return %c0_i32, %c0_i32_0 : i32, i32
  }
  func.func @transform_10(%arg0: i32) -> (i32, i32) {
    %c0_i32 = arith.constant 0 : i32
    %c0_i32_0 = arith.constant 0 : i32
    %c0_i32_1 = arith.constant 0 : i32
    return %c0_i32, %c0_i32_0 : i32, i32
  }
  func.func @transform_11(%arg0: i32) -> (i32, i32) {
    %c0_i32 = arith.constant 0 : i32
    %c0_i32_0 = arith.constant 0 : i32
    %c0_i32_1 = arith.constant 0 : i32
    return %c0_i32, %c0_i32_0 : i32, i32
  }
  func.func @transform_12(%arg0: i32) -> (i32, i32) {
    %c0_i32 = arith.constant 0 : i32
    %c0_i32_0 = arith.constant 0 : i32
    %c0_i32_1 = arith.constant 0 : i32
    return %c0_i32, %c0_i32_0 : i32, i32
  }
  func.func @transform_13(%arg0: i32) -> (i32, i32) {
    %c0_i32 = arith.constant 0 : i32
    %c0_i32_0 = arith.constant 0 : i32
    %c0_i32_1 = arith.constant 0 : i32
    return %c0_i32, %c0_i32_0 : i32, i32
  }
  func.func @transform_14(%arg0: i32) -> (i32, i32) {
    %c0_i32 = arith.constant 0 : i32
    %c0_i32_0 = arith.constant 0 : i32
    %c0_i32_1 = arith.constant 0 : i32
    return %c0_i32, %c0_i32_0 : i32, i32
  }
  func.func @transform_15(%arg0: i32) -> (i32, i32) {
    %c0_i32 = arith.constant 0 : i32
    %c0_i32_0 = arith.constant 0 : i32
    %c0_i32_1 = arith.constant 0 : i32
    return %c0_i32, %c0_i32_0 : i32, i32
  }
  func.func @transform_16(%arg0: i32) -> (i32, i32) {
    %c0_i32 = arith.constant 0 : i32
    %c0_i32_0 = arith.constant 0 : i32
    %c0_i32_1 = arith.constant 0 : i32
    return %c0_i32, %c0_i32_0 : i32, i32
  }
  func.func @transform_17(%arg0: i32) -> (i32, i32) {
    %c0_i32 = arith.constant 0 : i32
    %c0_i32_0 = arith.constant 0 : i32
    return %arg0, %c0_i32 : i32, i32
  }
}

</mosaic_0001>

<bundles_post_ra>
// kernel: tpu_custom_call.1
= control target key start
LH: loop header
LB: loop body
LE: loop exit
PB: predicated region body
PF: predicated region fallthrough
CT: control target
= control target key end

     0   :  { %v1454_v0 = vmov 0.0|0.0   ;;  %vm95_vm0 = vcmask 646144   ;;  %vm99_vm1 = vcmask 1046528   ;;  %vm1455_vm2 = vmmov 1   ;;  %s1458_s23 = smov 1   ;;  %s2037_s4 = inlined_call_operand.vmem [shape: f32[207,24], index: 4, kind: input, shape index: {}]   ;;  %s2038_s0 = inlined_call_operand.vmem [shape: f32[8,207], index: 0, kind: input, shape index: {}]   ;;  %s2039_s6 = inlined_call_operand.vmem [shape: f32[24,24], index: 6, kind: input, shape index: {}]   ;;  %s2040_s5 = inlined_call_operand.vmem [shape: f32[1,24], index: 5, kind: input, shape index: {}]   ;;  %s2041_s8 = inlined_call_operand.vmem [shape: f32[24,24], index: 8, kind: input, shape index: {}]   ;;  %s2042_s7 = inlined_call_operand.vmem [shape: f32[1,24], index: 7, kind: input, shape index: {}]   ;;  %s2043_s10 = inlined_call_operand.vmem [shape: f32[24,24], index: 10, kind: input, shape index: {}]   ;;  %s2044_s9 = inlined_call_operand.vmem [shape: f32[1,24], index: 9, kind: input, shape index: {}]   ;;  %s2045_s12 = inlined_call_operand.vmem [shape: f32[24,6], index: 12, kind: input, shape index: {}]   ;;  %s2046_s2 = inlined_call_operand.vmem [shape: f32[8,3], index: 2, kind: input, shape index: {}]   ;;  %s2047_s11 = inlined_call_operand.vmem [shape: f32[1,24], index: 11, kind: input, shape index: {}]   ;;  %s2048_s13 = inlined_call_operand.vmem [shape: f32[1,6], index: 13, kind: input, shape index: {}]   ;;  %s2049_s1 = inlined_call_operand.vmem [shape: f32[8,1], index: 1, kind: input, shape index: {}]   ;;  %s2050_s14 = inlined_call_operand.vmem [shape: f32[3,207], index: 14, kind: input, shape index: {}]   ;;  %s2051_s15 = inlined_call_operand.vmem [shape: f32[1,207], index: 15, kind: input, shape index: {}]   ;;  %s2052_s16 = inlined_call_operand.vmem [shape: f32[1,207], index: 16, kind: input, shape index: {}]   ;;  %s2053_s3 = inlined_call_operand.vmem [shape: f32[8,207], index: 3, kind: input, shape index: {}]   ;;  %s2054_s17 = inlined_call_operand.vmem [shape: f32[8,2], index: 17, kind: output, shape index: {}]  }
   0x1   :  { %2057 = sst [smem:[#allocation2_spill]] %s2037_s4  ;;  %1319 = vmatprep.subr.bf16.mxu0 %v1454_v0  ;;  %1359 = vmatprep.subr.bf16.mxu1 %v1454_v0  ;;  %vm1357_vm3 = vmpackc.low %vm99_vm1, %vm1455_vm2  ;;  %v174_v42 = vld [vmem:[%s2039_s6] sm:$0xff]  ;;  %v175_v43 = vld [vmem:[%s2039_s6 + $0x8] sm:$0xff]  ;;  %v1456_v45 = vmov 0.0   ;;  %vm1457_vm4 = vmmov 0   ;;  %vm184_vm5 = vcmask 195584  }
   0x2   :  { %2058 = sst [smem:[#allocation3_spill]] %s2038_s0  ;;  %s2059_s26 = sld [smem:[#allocation2_spill]]  ;;  %v1360_v44 = vpack.c.bf16 %v175_v43, %v174_v42  ;;  %v176_v46 = vld [vmem:[%s2039_s6 + $0x10] sm:$0xff]  ;;  %1289 = vmatprep.mubr.msk.f32.mxu1 %vm1457_vm4, %v1456_v45  ;;  %v1239_v47 = vld [vmem:[%s2040_s5] ss:$0 sm:$0xff]  ;;  %v260_v49 = vld [vmem:[%s2041_s8 + $0x8] sm:$0xff] }
   0x3   :  { %s2060_s29 = sld [smem:[#allocation3_spill]]  ;;  %v259_v48 = vld [vmem:[%s2041_s8] sm:$0xff]  ;;  %v261_v55 = vld [vmem:[%s2041_s8 + $0x10] sm:$0xff]  ;;  %v344_v58 = vld [vmem:[%s2043_s10 + $0x8] sm:$0xff]  ;;  %s1459_s5 = smov 2  }
   0x4   :  { %1361 = vmatpush3.bf16.msra.mxu1 %v1360_v44  ;;  %v1363_v53 = vpack.c.bf16 %v260_v49, %v259_v48  ;;  %v1242_v56 = vld [vmem:[%s2042_s7] ss:$0 sm:$0xff]  ;;  %s1460_s6 = smov 3   ;;  %v1463_v42 = vmov 2475754826  }
   0x5   :  { %1287 = vmatprep.subr.mxu1 %v1456_v45  ;;  %v343_v57 = vld [vmem:[%s2043_s10] sm:$0xff]  ;;  %v1465_v48 = vmov 2102212464  }
   0x6   :  { %v1366_v62 = vpack.c.bf16 %v344_v58, %v343_v57 }
   0x8   :  { %v62_v1 = vld [vmem:[%s2059_s26] sm:$0xff]  ;;  %v63_v2 = vld [vmem:[%s2059_s26 + $0x8] sm:$0xff]  ;;  %v64_v3 = vld [vmem:[%s2059_s26 + $0x10] sm:$0xff]  ;;  %1288 = vmatpush3.msra.mxu1 %v176_v46 }
   0x9   :  { %v1320_v4 = vpack.c.bf16 %v63_v2, %v62_v1  ;;  %v65_v5 = vld [vmem:[%s2059_s26 + $0x18] sm:$0xff]  ;;  %v66_v7 = vld [vmem:[%s2059_s26 + $0x20] sm:$0xff]  ;;  %v67_v8 = vld [vmem:[%s2059_s26 + $0x28] sm:$0xff]  ;;  %1362 = vmatprep.subr.bf16.mxu1 %v1454_v0 }
   0xa   :  { %v1323_v6 = vpack.c.bf16 %v65_v5, %v64_v3  ;;  %v1326_v9 = vpack.c.bf16 %v67_v8, %v66_v7  ;;  %v68_v10 = vld [vmem:[%s2059_s26 + $0x30] sm:$0xff]  ;;  %v69_v11 = vld [vmem:[%s2059_s26 + $0x38] sm:$0xff]  ;;  %v1593_v12 = vld [vmem:[%s2060_s29 + $0x8] sm:$0xff] }
   0xb   :  { %1321 = vmatpush1.bf16.msra.mxu0 %v1320_v4  ;;  %1241 = vmatprep.mubr.msk.f32.mxu0 %vm95_vm0, %v1593_v12  ;;  %v1329_v13 = vpack.c.bf16 %v69_v11, %v68_v10  ;;  %v70_v14 = vld [vmem:[%s2059_s26 + $0x40] sm:$0xff]  ;;  %v71_v15 = vld [vmem:[%s2059_s26 + $0x48] sm:$0xff]  ;;  %v72_v17 = vld [vmem:[%s2059_s26 + $0x50] sm:$0xff] }
   0xc   :  { %1322 = vmatprep.subr.bf16.mxu0 %v1454_v0  ;;  %v1332_v16 = vpack.c.bf16 %v71_v15, %v70_v14  ;;  %v73_v18 = vld [vmem:[%s2059_s26 + $0x58] sm:$0xff]  ;;  %v74_v20 = vld [vmem:[%s2059_s26 + $0x60] sm:$0xff]  ;;  %v75_v21 = vld [vmem:[%s2059_s26 + $0x68] sm:$0xff] }
   0xd   :  { %v1335_v19 = vpack.c.bf16 %v73_v18, %v72_v17  ;;  %v1338_v22 = vpack.c.bf16 %v75_v21, %v74_v20  ;;  %v76_v23 = vld [vmem:[%s2059_s26 + $0x70] sm:$0xff]  ;;  %v77_v24 = vld [vmem:[%s2059_s26 + $0x78] sm:$0xff]  ;;  %v78_v26 = vld [vmem:[%s2059_s26 + $0x80] sm:$0xff] }
   0xe   :  { %v1341_v25 = vpack.c.bf16 %v77_v24, %v76_v23  ;;  %v79_v27 = vld [vmem:[%s2059_s26 + $0x88] sm:$0xff]  ;;  %v80_v29 = vld [vmem:[%s2059_s26 + $0x90] sm:$0xff]  ;;  %v81_v30 = vld [vmem:[%s2059_s26 + $0x98] sm:$0xff] }
   0xf   :  { %1324 = vmatpush1.bf16.msra.mxu0 %v1323_v6  ;;  %v1344_v28 = vpack.c.bf16 %v79_v27, %v78_v26  ;;  %v1347_v31 = vpack.c.bf16 %v81_v30, %v80_v29  ;;  %v82_v32 = vld [vmem:[%s2059_s26 + $0xa0] sm:$0xff]  ;;  %v83_v33 = vld [vmem:[%s2059_s26 + $0xa8] sm:$0xff]  ;;  %v84_v35 = vld [vmem:[%s2059_s26 + $0xb0] sm:$0xff] }
  0x10   :  { %1325 = vmatprep.subr.bf16.mxu0 %v1454_v0  ;;  %v1350_v34 = vpack.c.bf16 %v83_v33, %v82_v32  ;;  %v85_v36 = vld [vmem:[%s2059_s26 + $0xb8] sm:$0xff]  ;;  %v86_v38 = vld [vmem:[%s2059_s26 + $0xc0] sm:$0xff]  ;;  %v87_v39 = vld [vmem:[%s2059_s26 + $0xc8] sm:$0x7f] }
  0x11   :  { %v1353_v37 = vpack.c.bf16 %v85_v36, %v84_v35  ;;  %v1356_v40 = vpack.c.bf16 %v87_v39, %v86_v38  ;;  %v1664_v41 = vld [vmem:[%s2060_s29] sm:$0xff]  ;;  %v345_v1 = vld [vmem:[%s2043_s10 + $0x10] sm:$0xff]  ;;  %v428_v4 = vld [vmem:[%s2045_s12 + $0x8] sm:$0xff]  ;;  %v1462_v39 = vmov 683565275  }
  0x12   :  { %v1244_v2 = vld [vmem:[%s2044_s9] ss:$0 sm:$0xff] }
  0x13   :  { %1327 = vmatpush1.bf16.msra.mxu0 %v1326_v9  ;;  %v427_v3 = vld [vmem:[%s2045_s12] sm:$0xff] }
  0x14   :  { %1328 = vmatprep.subr.bf16.mxu0 %v1454_v0  ;;  %v1369_v8 = vpack.c.bf16 %v428_v4, %v427_v3  ;;  %v59_v10 = vld [vmem:[%s2046_s2] sm:$0xff]  ;;  %s1461_s2 = smov 127  }
  0x15   :  { %513 = vrot.lane.b32.xlu1 %v59_v10, %s1458_s23  ;;  %522 = vrot.lane.b32.xlu0 %v59_v10, %s1459_s5  ;;  %v1246_v11 = vld [vmem:[%s2047_s11] ss:$0 sm:$0xff]  ;;  %s1469_s11 = smov 126  }
  0x16   :  { %v1248_v17 = vld [vmem:[%s2048_s13] ss:$0 sm:$0xff] }
  0x17   :  { %1330 = vmatpush1.bf16.msra.mxu0 %v1329_v13 }
  0x18   :  { %1331 = vmatprep.subr.bf16.mxu0 %v1454_v0 }
  0x19   :  { %531 = vrot.lane.b32.xlu1 %v59_v10, %s1460_s6 }
  0x1b   :  { %1333 = vmatpush1.bf16.msra.mxu0 %v1332_v16 }
  0x1c   :  { %1334 = vmatprep.subr.bf16.mxu0 %v1454_v0 }
  0x1f   :  { %1336 = vmatpush1.bf16.msra.mxu0 %v1335_v19 }
  0x20   :  { %1337 = vmatprep.subr.bf16.mxu0 %v1454_v0 }
  0x23   :  { %1339 = vmatpush1.bf16.msra.mxu0 %v1338_v22 }
  0x24   :  { %1340 = vmatprep.subr.bf16.mxu0 %v1454_v0 }
  0x27   :  { %1342 = vmatpush1.bf16.msra.mxu0 %v1341_v25 }
  0x28   :  { %1343 = vmatprep.subr.bf16.mxu0 %v1454_v0 }
  0x2b   :  { %1345 = vmatpush1.bf16.msra.mxu0 %v1344_v28 }
  0x2c   :  { %1346 = vmatprep.subr.bf16.mxu0 %v1454_v0 }
  0x2f   :  { %1348 = vmatpush1.bf16.msra.mxu0 %v1347_v31 }
  0x30   :  { %1349 = vmatprep.subr.bf16.mxu0 %v1454_v0 }
  0x33   :  { %1351 = vmatpush1.bf16.msra.mxu0 %v1350_v34 }
  0x34   :  { %1352 = vmatprep.subr.bf16.mxu0 %v1454_v0 }
  0x37   :  { %1354 = vmatpush1.bf16.msra.mxu0 %v1353_v37 }
  0x38   :  { %1355 = vmatprep.subr.bf16.mxu0 %v1454_v0 }
  0x3b   :  { %1358 = vmatpush1.bf16.msk.msra.mxu0 %vm1357_vm3, %v1356_v40 }
  0x3e   :  { %168 = vmatmul.mubr.f32.vlgmr.msra.gmra.mrb[0].mxu0 %v1664_v41 }
  0x87   :  { %v523_v22 = vpop.permute.xlu0 %522  ;;  %v514_v25 = vpop.permute.xlu1 %513 }
 0x111   :  { %v169_v50 = vpop.f32.mrb[0].mxu0 }
 0x112   :  { %v170_v51 = vadd.f32 %v1239_v47, %v169_v50  ;;  %v171_v52 = vpop.f32.mrb[1].mxu0 }
 0x114   :  { %v173_v54 = vmax.f32 %v170_v51, 0.0  ;;  %v1466_v51 = vmov 920167782  }
 0x116   :  { %1290 = vmatmul.mubr.msk.f32.vlgmr.msra.gmra.mrb[0].mxu1 %vm184_vm5, %v173_v54  ;;  %v1467_v54 = vmov 1326507024  }
 0x117   :  { %1364 = vmatpush3.bf16.msra.mxu1 %v1363_v53  ;;  %1298 = vmatprep.mubr.msk.f32.mxu1 %vm1457_vm4, %v1456_v45 }
 0x118   :  { %1296 = vmatprep.subr.mxu1 %v1456_v45 }
 0x11b   :  { %1297 = vmatpush3.msra.mxu1 %v261_v55 }
 0x11c   :  { %1365 = vmatprep.subr.bf16.mxu1 %v1454_v0 }
 0x1e9   :  { %v254_v59 = vpop.f32.mrb[0].mxu1 }
 0x1ea   :  { %v255_v60 = vadd.f32 %v1242_v56, %v254_v59  ;;  %v1291_v61 = vpop.f32.mrb[1].mxu1 }
 0x1ec   :  { %v258_v63 = vmax.f32 %v255_v60, 0.0 }
 0x1ee   :  { %1299 = vmatmul.mubr.msk.f32.vlgmr.msra.gmra.mrb[2].mxu1 %vm184_vm5, %v258_v63 }
 0x1ef   :  { %1367 = vmatpush3.bf16.msra.mxu1 %v1366_v62  ;;  %1307 = vmatprep.mubr.msk.f32.mxu1 %vm1457_vm4, %v1456_v45 }
 0x1f0   :  { %1305 = vmatprep.subr.mxu1 %v1456_v45 }
 0x1f3   :  { %1306 = vmatpush3.msra.mxu1 %v345_v1 }
 0x1f4   :  { %1368 = vmatprep.subr.bf16.mxu1 %v1454_v0  ;;  %v429_v0 = vld [vmem:[%s2045_s12 + $0x10] sm:$0xff] }
 0x2c1   :  { %v338_v5 = vpop.f32.mrb[2].mxu1 }
 0x2c2   :  { %v339_v6 = vadd.f32 %v1244_v2, %v338_v5  ;;  %v1300_v7 = vpop.f32.mrb[3].mxu1 }
 0x2c4   :  { %v342_v9 = vmax.f32 %v339_v6, 0.0 }
 0x2c6   :  { %1308 = vmatmul.mubr.msk.f32.vlgmr.msra.gmra.mrb[4].mxu1 %vm184_vm5, %v342_v9 }
 0x2c7   :  { %1370 = vmatpush3.bf16.msra.mxu1 %v1369_v8  ;;  %1316 = vmatprep.mubr.msk.f32.mxu1 %vm1457_vm4, %v1456_v45 }
 0x2c8   :  { %1314 = vmatprep.subr.mxu1 %v1456_v45  ;;  %v1464_v45 = vmov 2131351028  }
 0x2cb   :  { %1315 = vmatpush3.msra.mxu1 %v429_v0 }
 0x399   :  { %v422_v13 = vpop.f32.mrb[4].mxu1 }
 0x39a   :  { %v423_v14 = vadd.f32 %v1246_v11, %v422_v13  ;;  %v1309_v15 = vpop.f32.mrb[5].mxu1 }
 0x39c   :  { %v426_v16 = vmax.f32 %v423_v14, 0.0 }
 0x39e   :  { %1317 = vmatmul.mubr.msk.f32.vlgmr.msra.gmra.mrb[6].mxu1 %vm184_vm5, %v426_v16 }
 0x471   :  { %v506_v18 = vpop.f32.mrb[6].mxu1 }
 0x472   :  { %v1733_v19 = vadd.f32 %v1248_v17, %v506_v18  ;;  %v1318_v20 = vpop.f32.mrb[7].mxu1 }
 0x474   :  { %v510_v21 = vmul.f32 1.442695, %v1733_v19 }
 0x476   :  { %1396 = vpow2.f32 %v510_v21 }
 0x480   :  { %v1736_v23 = vpop.eup %1396 }
 0x481   :  { %v525_v24 = vmul.f32 %v1736_v23, %v523_v22  ;;  %v516_v26 = vmul.f32 %v1736_v23, %v514_v25 }
 0x483   :  { %527 = vrot.lane.b32.xlu0 %v525_v24, %s1461_s2 }
 0x487   :  { %518 = vrot.lane.b32.xlu0 %v516_v26, %s1461_s2 }
 0x4f5   :  { %v528_v27 = vpop.permute.xlu0 %527 }
 0x4f6   :  { %v1743_v28 = vadd.f32 %v528_v27, %v1733_v19 }
 0x4f8   :  { %v543_v29 = vand.u32 2139095040, %v1743_v28  ;;  %v540_v33 = vand.u32 2147483647, %v1743_v28  ;;  %vm542_vm13 = vcmp.lt.s32.totalorder %v1743_v28, 0 }
 0x4fa   :  { %v544_v30 = vshrl.u32 %v543_v29, 23  ;;  %v547_v36 = vand.u32 8388607, %v540_v33  ;;  %vm541_vm14 = vcmp.le.f32.partialorder %v540_v33, 0.7853982 }
 0x4fc   :  { %v1250_v31 = vadd.s32 4294967169, %v544_v30  ;;  %v548_v56 = vor.u32 8388608, %v547_v36 }
 0x4fe   :  { %v550_v32 = vadd.s32 1, %v1250_v31  ;;  %v588_v7 = vshll.u32 %v548_v56, 8 }
 0x500   :  { %vm551_vm6 = vcmp.gt.s32.totalorder %v550_v32, 0 }
 0x501   :  { %v552_v34 = vsel %vm551_vm6, %v550_v32, 0  ;;  %vm632_vm6 = vweird.f32 %v1743_v28 }
 0x502   :  { %v554_v35 = vand.u32 31, %v552_v34  ;;  %v553_v38 = vshrl.u32 %v552_v34, 5 }
 0x504   :  { %v555_v37 = vsub.s32 32, %v554_v35  ;;  %v557_v40 = vshll.u32 %v1462_v39, %v554_v35  ;;  %v560_v43 = vshll.u32 %v1463_v42, %v554_v35  ;;  %v563_v47 = vshll.u32 %v1464_v45, %v554_v35 }
 0x505   :  { %v566_v50 = vshll.u32 %v1465_v48, %v554_v35  ;;  %v569_v53 = vshll.u32 %v1466_v51, %v554_v35  ;;  %vm572_vm7 = vcmp.lt.s32.totalorder %v553_v38, 1  ;;  %vm575_vm8 = vcmp.lt.s32.totalorder %v553_v38, 4 }
 0x506   :  { %v558_v44 = vshrl.u32 %v1463_v42, %v555_v37  ;;  %v561_v46 = vshrl.u32 %v1464_v45, %v555_v37  ;;  %v564_v49 = vshrl.u32 %v1465_v48, %v555_v37  ;;  %v567_v52 = vshrl.u32 %v1466_v51, %v555_v37 }
 0x507   :  { %v570_v55 = vshrl.u32 %v1467_v54, %v555_v37  ;;  %v556_v2 = vshrl.u32 %v1462_v39, %v555_v37  ;;  %vm574_vm9 = vcmp.lt.s32.totalorder %v553_v38, 3  ;;  %vm573_vm10 = vcmp.lt.s32.totalorder %v553_v38, 2 }
 0x508   :  { %v559_v57 = vor.u32 %v558_v44, %v557_v40  ;;  %v562_v58 = vor.u32 %v561_v46, %v560_v43  ;;  %v565_v59 = vor.u32 %v564_v49, %v563_v47  ;;  %v568_v60 = vor.u32 %v567_v52, %v566_v50 }
 0x509   :  { %v571_v61 = vor.u32 %v570_v55, %v569_v53  ;;  %v1468_v54 = vmov 0  }
 0x50a   :  { %v577_v62 = vsel %vm575_vm8, %v565_v59, 2102212464  ;;  %v580_v63 = vsel %vm572_vm7, %v559_v57, %v562_v58  ;;  %v584_v1 = vsel %vm572_vm7, %v562_v58, %v565_v59  ;;  %v581_v3 = vsel %vm575_vm8, %v568_v60, 920167782  ;;  %1394 = vset.pattern.permute.xlu1 %v1468_v54  ;;  %1393 = vset.pattern.permute.xlu0 %v1468_v54 }
 0x50b   :  { %v585_v4 = vsel %vm575_vm8, %v571_v61, 1326507024  ;;  %v582_v5 = vsel %vm574_vm9, %v565_v59, %v581_v3  ;;  %v576_v8 = vsel %vm572_vm7, %v556_v2, %v559_v57  ;;  %v578_v9 = vsel %vm574_vm9, %v562_v58, %v577_v62  ;;  %v532_v3 = vpop.permute.xlu1 %531 }
 0x50c   :  { %v586_v6 = vsel %vm574_vm9, %v568_v60, %v585_v4  ;;  %v583_v0 = vsel %vm573_vm10, %v580_v63, %v582_v5  ;;  %v579_v16 = vsel %vm573_vm10, %v576_v8, %v578_v9  ;;  %vm1231_vm7 = vcmask 7168  }
 0x50d   :  { %v587_v10 = vsel %vm573_vm10, %v584_v1, %v586_v6  ;;  %v1752_v14 = vmul.u32.u64.low %v588_v7, %v583_v0  ;;  %v1753_v15 = vmul.u32.u64.high %v588_v7, %v583_v0, %v1752_v14  ;;  %v595_v18 = vmul.u32 %v588_v7, %v579_v16 }
 0x50e   :  { %v1749_v11 = vmul.u32.u64.low %v588_v7, %v587_v10  ;;  %v1750_v13 = vmul.u32.u64.high %v588_v7, %v587_v10, %v1749_v11  ;;  %v534_v6 = vmul.f32 %v1736_v23, %v532_v3  ;;  %v519_v7 = vpop.permute.xlu0 %518  ;;  %v1264_v16 = vadd.f32 -3.1415927, %v1733_v19 }
 0x50f   :  { %v598_v17 = vadd.s32 1, %v1753_v15  ;;  %v521_v8 = vadd.f32 %v1736_v23, %v519_v7  ;;  %vm1233_vm8 = vcmask 15360  }
 0x510   :  { %vm597_vm11 = vc.u32 %v1750_v13, %v1752_v14  ;;  %v596_v34 = vadd.s32 %v1752_v14, %v1750_v13  ;;  %v58_v13 = vld [vmem:[%s2049_s1] sm:$0xff] }
 0x511   :  { %v599_v20 = vsel %vm597_vm11, %v598_v17, %v1753_v15  ;;  %v1211_v15 = vadd.f32 5.0, %v1733_v19  ;;  %v1470_v17 = vmov 4  }
 0x512   :  { %v600_v21 = vadd.s32 %v599_v20, %v595_v18  ;;  %v1262_v20 = vadd.f32 -1.0, %v1736_v23 }
 0x513   :  { %v1212_v18 = vmul.f32 %v1211_v15, %v1211_v15 }
 0x514   :  { %v601_v22 = vadd.s32 536870912, %v600_v21 }
 0x516   :  { %v602_v24 = vshrl.u32 %v601_v22, 30  ;;  %v1190_v22 = vmul.f32 %v1262_v20, %v1262_v20 }
 0x518   :  { %v603_v25 = vshll.u32 %v602_v24, 30  ;;  %v626_v47 = vsub.s32 4, %v602_v24 }
 0x51a   :  { %v604_v26 = vsub.s32 %v600_v21, %v603_v25  ;;  %v627_v50 = vsel %vm542_vm13, %v626_v47, %v602_v24  ;;  %v1201_v21 = vmul.f32 %v1264_v16, %v1264_v16  ;;  %v655_v24 = vlaneseq }
 0x51b   :  { %v629_v52 = vsel %vm541_vm14, 0, %v627_v50 }
 0x51c   :  { %v606_v27 = vsub.s32 0, %v604_v26  ;;  %v760_v53 = vadd.s32 3, %v629_v52  ;;  %v633_v55 = vand.u32 3, %v629_v52  ;;  %v656_v25 = vshrl.u32 %v655_v24, 7 }
 0x51d   :  { %v1802_v52 = vmul.f32 %v1736_v23, %v1736_v23  ;;  %v1199_v23 = vsub.f32 2.5310242, %v1733_v19 }
 0x51e   :  { %v1251_v29 = vmin.u32 %v606_v27, %v604_v26  ;;  %v761_v56 = vand.u32 3, %v760_v53  ;;  %vm638_vm15 = vcmp.eq.s32.totalorder %v633_v55, 2  ;;  %vm635_vm2 = vcmp.eq.s32.totalorder %v633_v55, 0  ;;  %v846_v53 = vld [vmem:[%s2051_s15] sm:$0x3]  ;;  %s1471_s15 = smov 124  }
 0x51f   :  { %vm634_vm4 = vcmp.lt.s32.totalorder %v633_v55, 2  ;;  %v1781_v27 = vsub.s32 1, %v656_v25 }
 0x520   :  { %v608_v30 = vclz %v1251_v29  ;;  %vm766_vm1 = vcmp.eq.s32.totalorder %v761_v56, 2  ;;  %vm763_vm3 = vcmp.eq.s32.totalorder %v761_v56, 0  ;;  %vm762_vm5 = vcmp.lt.s32.totalorder %v761_v56, 2  ;;  %v1258_v29 = vld [vmem:[%s2050_s14 + $0x1] ss:$4 sm:$0x3] }
 0x522   :  { %v1252_v31 = vadd.s32 4294967294, %v608_v30  ;;  %v648_v30 = vld [vmem:[%s2050_s14] ss:$4 sm:$0x3] }
 0x524   :  { %vm1253_vm12 = vcmp.lt.s32.totalorder %v1252_v31, 0 }
 0x525   :  { %v611_v32 = vsel %vm1253_vm12, 0, %v1252_v31 }
 0x526   :  { %v612_v35 = vsub.s32 32, %v611_v32  ;;  %v616_v36 = vsub.s32 4294967266, %v611_v32  ;;  %v613_v37 = vshll.u32 %v604_v26, %v611_v32  ;;  %v1779_v26 = vsub.s32 0, %v656_v25 }
 0x527   :  { %v791_v32 = vrot.slane %v1258_v29, %v1781_v27 }
 0x528   :  { %v614_v38 = vshrl.u32 %v596_v34, %v612_v35  ;;  %v617_v39 = vadd.s32 127, %v616_v36  ;;  %v787_v31 = vrot.slane %v1258_v29, %v1779_v26  ;;  %v658_v34 = vrot.slane %v648_v30, %v1779_v26  ;;  %v1259_v36 = vld [vmem:[%s2050_s14 + $0x2] ss:$4 sm:$0x3] }
 0x529   :  { %v662_v35 = vrot.slane %v648_v30, %v1781_v27 }
 0x52a   :  { %v615_v40 = vor.u32 %v614_v38, %v613_v37  ;;  %v618_v42 = vshll.u32 %v617_v39, 23  ;;  %v809_v39 = vrot.slane %v1259_v36, %v1779_v26 }
 0x52c   :  { %v619_v43 = vor.u32 4788187, %v618_v42  ;;  %v622_v45 = vcvt.s32.f32 %v615_v40  ;;  %v813_v40 = vrot.slane %v1259_v36, %v1781_v27 }
 0x52e   :  { %v620_v44 = vand.u32 2147483647, %v619_v43 }
 0x530   :  { %v623_v46 = vmul.f32 %v622_v45, %v620_v44 }
 0x532   :  { %v624_v48 = vxor.u32 2147483648, %v623_v46 }
 0x534   :  { %v625_v49 = vsel %vm542_vm13, %v624_v48, %v623_v46 }
 0x535   :  { %v628_v51 = vsel %vm541_vm14, %v1743_v28, %v625_v49 }
 0x536   :  { %1398 = vcosq.f32 %v628_v51 }
 0x537   :  { %1400 = vsinq.f32 %v628_v51 }
 0x540   :  { %v1399_v57 = vpop.eup %1398 }
 0x541   :  { %v1401_v58 = vpop.eup %1400  ;;  %v639_v59 = vxor.u32 2147483648, %v1399_v57 }
 0x542   :  { %v636_v60 = vxor.u32 2147483648, %v1401_v58 }
 0x543   :  { %v640_v33 = vsel %vm638_vm15, %v639_v59, %v1401_v58  ;;  %v768_v61 = vsel %vm766_vm1, %v639_v59, %v1401_v58 }
 0x544   :  { %v637_v62 = vsel %vm635_vm2, %v1399_v57, %v636_v60  ;;  %v765_v63 = vsel %vm763_vm3, %v1399_v57, %v636_v60 }
 0x545   :  { %v641_v1 = vsel %vm634_vm4, %v637_v62, %v640_v33  ;;  %v769_v2 = vsel %vm762_vm5, %v765_v63, %v768_v61  ;;  %v1810_v61 = vrot.slane %v846_v53, %v1779_v26 }
 0x546   :  { %v642_v4 = vsel %vm632_vm6, nan, %v641_v1  ;;  %v770_v5 = vsel %vm632_vm6, nan, %v769_v2 }
 0x547   :  { %644 = vrot.lane.b32.xlu1 %v642_v4, %s1469_s11  ;;  %772 = vrot.lane.b32.xlu0 %v770_v5, %s1469_s11  ;;  %v1210_v5 = vsub.f32 -0.6931472, %v1733_v19 }
 0x54b   :  { %536 = vrot.lane.b32.xlu1 %v534_v6, %s1461_s2 }
 0x5b9   :  { %v645_v9 = vpop.permute.xlu1 %644  ;;  %v773_v0 = vpop.permute.xlu0 %772 }
 0x5ba   :  { %v647_v28 = vmul.f32 %v645_v9, %v521_v8  ;;  %v775_v10 = vmul.f32 %v773_v0, %v521_v8  ;;  %v855_v0 = vrot.slane %v846_v53, %v1781_v27 }
 0x5bc   :  { %651 = vperm.xlu0 %1393, %v647_v28   ;;  %780 = vperm.xlu1 %1394, %v775_v10  }
 0x5bd   :  { %v537_v11 = vpop.permute.xlu1 %536 }
 0x5be   :  { %v539_v14 = vadd.f32 %v537_v11, %v1733_v19 }
 0x5c0   :  { %914 = vperm.xlu0 %1393, %v58_v13   ;;  %1395 = vset.pattern.permute.xlu1 %v1470_v17 }
 0x5c1   :  { %802 = vperm.xlu1 %1395, %v539_v14  }
 0x5c4   :  { %1214 = vrot.lane.b32.xlu0 %v1212_v18, %s1458_s23 }
 0x5c5   :  { %1203 = vrot.lane.b32.xlu1 %v1201_v21, %s1458_s23 }
 0x5c8   :  { %1192 = vrot.lane.b32.xlu0 %v1190_v22, %s1458_s23 }
 0x63b   :  { %v781_v37 = vpop.permute.xlu1 %780  ;;  %v652_v38 = vpop.permute.xlu0 %651 }
 0x63c   :  { %v794_v42 = vmul.f32 %v787_v31, %v781_v37  ;;  %v795_v43 = vmul.f32 %v791_v32, %v781_v37  ;;  %v665_v44 = vmul.f32 %v658_v34, %v652_v38  ;;  %v666_v45 = vmul.f32 %v662_v35, %v652_v38 }
 0x63e   :  { %v796_v48 = vadd.f32 %v794_v42, %v665_v44  ;;  %v797_v49 = vadd.f32 %v795_v43, %v666_v45 }
 0x63f   :  { %v1798_v46 = vpop.permute.xlu0 %914 }
 0x640   :  { %v803_v47 = vpop.permute.xlu1 %802  ;;  %v1816_v7 = vadd.f32 %v1798_v46, %v1810_v61  ;;  %v1822_v11 = vadd.f32 %v1798_v46, %v855_v0 }
 0x641   :  { %v816_v50 = vmul.f32 %v809_v39, %v803_v47  ;;  %v817_v51 = vmul.f32 %v813_v40, %v803_v47 }
 0x642   :  { %v971_v10 = vadd.f32 33.458332, %v1816_v7  ;;  %v972_v17 = vadd.f32 33.458332, %v1822_v11  ;;  %v993_v29 = vadd.f32 7.0, %v1816_v7  ;;  %v994_v30 = vadd.f32 7.0, %v1822_v11 }
 0x643   :  { %v818_v54 = vadd.f32 %v816_v50, %v796_v48  ;;  %v819_v55 = vadd.f32 %v817_v51, %v797_v49  ;;  %v1215_v56 = vpop.permute.xlu0 %1214 }
 0x644   :  { %v1217_v57 = vadd.f32 %v1215_v56, %v1802_v52  ;;  %v1204_v58 = vpop.permute.xlu1 %1203  ;;  %v973_v13 = vmul.f32 %v971_v10, %v1816_v7  ;;  %v974_v21 = vmul.f32 %v972_v17, %v1822_v11  ;;  %v995_v38 = vmul.f32 %v993_v29, %v1816_v7 }
 0x645   :  { %v1260_v59 = vclamps-f32 %v818_v54, 30.0  ;;  %v1261_v60 = vclamps-f32 %v819_v55, 30.0  ;;  %v1206_v33 = vadd.f32 %v1204_v58, %v1802_v52  ;;  %v996_v40 = vmul.f32 %v994_v30, %v1822_v11 }
 0x646   :  { %v1218_v1 = vmul.f32 2.0, %v1217_v57  ;;  %v975_v20 = vadd.f32 466.3342, %v973_v13  ;;  %v976_v24 = vadd.f32 466.3342, %v974_v21  ;;  %v997_v48 = vadd.f32 6.0, %v995_v38 }
 0x647   :  { %v824_v62 = vsub.f32 0.0, %v1260_v59  ;;  %v825_v63 = vsub.f32 0.0, %v1261_v60  ;;  %v1207_v2 = vmul.f32 0.003166287, %v1206_v33  ;;  %v998_v51 = vadd.f32 6.0, %v996_v40 }
 0x648   :  { %v1219_v8 = vadd.f32 %v1218_v1, %v1210_v5  ;;  %v977_v22 = vmul.f32 %v975_v20, %v1816_v7  ;;  %v978_v32 = vmul.f32 %v976_v24, %v1822_v11  ;;  %v999_v33 = vmul.f32 %v997_v48, %v1816_v7 }
 0x649   :  { %v826_v3 = vmul.f32 1.442695, %v824_v62  ;;  %v828_v4 = vmul.f32 1.442695, %v825_v63  ;;  %v1208_v6 = vadd.f32 %v1207_v2, %v1199_v23  ;;  %v917_v23 = vsub.f32 %v1798_v46, %v1664_v41 }
 0x64a   :  { %v1266_v28 = vadd.f32 -0.5, %v1219_v8  ;;  %v979_v25 = vadd.f32 3465.7095, %v977_v22  ;;  %v980_v43 = vadd.f32 3465.7095, %v978_v32  ;;  %v1000_v1 = vmul.f32 %v998_v51, %v1822_v11 }
 0x64b   :  { %1402 = vpow2.f32 %v826_v3  ;;  %v1265_v9 = vadd.f32 -0.5, %v1208_v6  ;;  %v1001_v5 = vadd.f32 10.0, %v995_v38  ;;  %v918_v6 = vsub.f32 %v1798_v46, %v1593_v12 }
 0x64c   :  { %1404 = vpow2.f32 %v828_v4  ;;  %v981_v36 = vmul.f32 %v979_v25, %v1816_v7  ;;  %v982_v55 = vmul.f32 %v980_v43, %v1822_v11  ;;  %v1005_v10 = vadd.f32 12.0, %v995_v38 }
 0x64d   :  { %1222 = vrot.lane.b32.xlu0 %v1265_v9, %s1469_s11  ;;  %v1002_v9 = vadd.f32 10.0, %v996_v40  ;;  %v1006_v22 = vadd.f32 12.0, %v996_v40 }
 0x64e   :  { %v983_v45 = vadd.f32 14484.914, %v981_v36  ;;  %v984_v4 = vadd.f32 14484.914, %v982_v55 }
 0x650   :  { %v985_v58 = vmul.f32 %v983_v45, %v1816_v7 }
 0x651   :  { %1227 = vrot.lane.b32.xlu0 %v1266_v28, %s1471_s15  ;;  %v1003_v28 = vmul.f32 %v1001_v5, %v999_v33 }
 0x652   :  { %v987_v8 = vadd.f32 32281.064, %v985_v58 }
 0x653   :  { %v1007_v29 = vmul.f32 %v1005_v10, %v1003_v28 }
 0x654   :  { %v989_v21 = vmul.f32 %v987_v8, %v1816_v7 }
 0x655   :  { %v1403_v14 = vpop.eup %1402 }
 0x656   :  { %v1405_v15 = vpop.eup %1404  ;;  %v830_v16 = vadd.f32 1.0, %v1403_v14 }
 0x657   :  { %v831_v18 = vadd.f32 1.0, %v1405_v15 }
 0x658   :  { %1406 = vrcp.f32 %v830_v16 }
 0x659   :  { %1408 = vrcp.f32 %v831_v18 }
 0x662   :  { %v1407_v31 = vpop.eup %1406 }
 0x663   :  { %v1409_v34 = vpop.eup %1408  ;;  %v834_v35 = vmul.f32 %v1407_v31, %v830_v16  ;;  %v1012_v16 = vadd.f32 5.5, %v1822_v11 }
 0x664   :  { %v835_v37 = vmul.f32 %v1409_v34, %v831_v18  ;;  %v986_v18 = vmul.f32 %v984_v4, %v1822_v11 }
 0x665   :  { %v836_v39 = vsub.f32 2.0, %v834_v35 }
 0x666   :  { %v837_v42 = vsub.f32 2.0, %v835_v37  ;;  %v988_v37 = vadd.f32 32281.064, %v986_v18 }
 0x667   :  { %v838_v44 = vmul.f32 %v1407_v31, %v836_v39 }
 0x668   :  { %v839_v47 = vmul.f32 %v1409_v34, %v837_v42  ;;  %v991_v42 = vadd.f32 29969.594, %v989_v21 }
 0x669   :  { %v840_v49 = vmax.f32 %v838_v44, 1e-12  ;;  %v842_v50 = vmul.f32 %v1403_v14, %v838_v44 }
 0x66a   :  { %v841_v53 = vmax.f32 %v839_v47, 1e-12  ;;  %v843_v54 = vmul.f32 %v1405_v15, %v839_v47  ;;  %v1004_v15 = vmul.f32 %v1002_v9, %v1000_v1 }
 0x66b   :  { %v844_v56 = vmax.f32 %v842_v50, 1e-12  ;;  %v1836_v57 = vmul.f32 %v1810_v61, %v840_v49 }
 0x66c   :  { %v845_v59 = vmax.f32 %v843_v54, 1e-12  ;;  %v1839_v60 = vmul.f32 %v855_v0, %v841_v53  ;;  %v1008_v34 = vmul.f32 %v1006_v22, %v1004_v15  ;;  %v1889_v54 = vmul.f32 %v988_v37, %v1822_v11 }
 0x66d   :  { %v1845_v62 = vmul.f32 %v1810_v61, %v844_v56  ;;  %v1849_v63 = vadd.f32 %v1836_v57, %v1664_v41  ;;  %v1019_v1 = vadd.f32 33.458332, %v1836_v57  ;;  %v1041_v10 = vadd.f32 7.0, %v1836_v57 }
 0x66e   :  { %v1852_v2 = vmul.f32 %v855_v0, %v845_v59  ;;  %v1856_v3 = vadd.f32 %v1839_v60, %v1593_v12  ;;  %v1011_v0 = vadd.f32 5.5, %v1816_v7  ;;  %v1020_v28 = vadd.f32 33.458332, %v1839_v60 }
 0x66f   :  { %v864_v61 = vadd.f32 33.458332, %v1849_v63  ;;  %v1865_v14 = vadd.f32 %v917_v23, %v1845_v62  ;;  %v886_v46 = vadd.f32 7.0, %v1849_v63  ;;  %v904_v23 = vadd.f32 5.5, %v1849_v63 }
 0x670   :  { %v865_v41 = vadd.f32 33.458332, %v1856_v3  ;;  %v1871_v17 = vadd.f32 %v918_v6, %v1852_v2  ;;  %v887_v25 = vadd.f32 7.0, %v1856_v3  ;;  %1410 = vlog2.f32 %v1011_v0 }
 0x671   :  { %v866_v13 = vmul.f32 %v864_v61, %v1849_v63  ;;  %v921_v31 = vadd.f32 33.458332, %v1865_v14  ;;  %v888_v36 = vmul.f32 %v886_v46, %v1849_v63  ;;  %1412 = vlog2.f32 %v1012_v16 }
 0x672   :  { %v867_v12 = vmul.f32 %v865_v41, %v1856_v3  ;;  %v922_v32 = vadd.f32 33.458332, %v1871_v17  ;;  %v889_v44 = vmul.f32 %v887_v25, %v1856_v3  ;;  %v943_v45 = vadd.f32 7.0, %v1865_v14 }
 0x673   :  { %v868_v20 = vadd.f32 466.3342, %v866_v13  ;;  %v923_v39 = vmul.f32 %v921_v31, %v1865_v14  ;;  %1414 = vlog2.f32 %v1007_v29  ;;  %v944_v50 = vadd.f32 7.0, %v1871_v17 }
 0x674   :  { %v869_v24 = vadd.f32 466.3342, %v867_v12  ;;  %v924_v40 = vmul.f32 %v922_v32, %v1871_v17  ;;  %v890_v53 = vadd.f32 6.0, %v888_v36  ;;  %1416 = vlog2.f32 %v1008_v34 }
 0x675   :  { %v870_v30 = vmul.f32 %v868_v20, %v1849_v63  ;;  %v925_v48 = vadd.f32 466.3342, %v923_v39  ;;  %1418 = vlog2.f32 %v991_v42  ;;  %v891_v33 = vadd.f32 6.0, %v889_v44 }
 0x676   :  { %v871_v35 = vmul.f32 %v869_v24, %v1856_v3  ;;  %v926_v49 = vadd.f32 466.3342, %v924_v40  ;;  %v945_v6 = vmul.f32 %v943_v45, %v1865_v14  ;;  %v1897_v61 = vmul.f32 %v944_v50, %v1871_v17 }
 0x677   :  { %v872_v38 = vadd.f32 3465.7095, %v870_v30  ;;  %v927_v56 = vmul.f32 %v925_v48, %v1865_v14  ;;  %v892_v9 = vmul.f32 %v890_v53, %v1849_v63  ;;  %v905_v41 = vadd.f32 5.5, %v1856_v3 }
 0x678   :  { %v873_v43 = vadd.f32 3465.7095, %v871_v35  ;;  %v928_v58 = vmul.f32 %v926_v49, %v1871_v17  ;;  %v893_v46 = vmul.f32 %v891_v33, %v1856_v3  ;;  %v894_v18 = vadd.f32 10.0, %v888_v36 }
 0x679   :  { %v874_v47 = vmul.f32 %v872_v38, %v1849_v63  ;;  %v929_v4 = vadd.f32 3465.7095, %v927_v56  ;;  %1420 = vlog2.f32 %v904_v23  ;;  %v1042_v20 = vadd.f32 7.0, %v1839_v60 }
 0x67a   :  { %v875_v51 = vmul.f32 %v873_v43, %v1856_v3  ;;  %v930_v5 = vadd.f32 3465.7095, %v928_v58  ;;  %v1899_v8 = vpop.eup %1410  ;;  %v947_v24 = vadd.f32 6.0, %v945_v6  ;;  %v948_v25 = vadd.f32 6.0, %v1897_v61 }
 0x67b   :  { %v876_v55 = vadd.f32 14484.914, %v874_v47  ;;  %v931_v15 = vmul.f32 %v929_v4, %v1865_v14  ;;  %v1909_v12 = vpop.eup %1412  ;;  %v895_v30 = vadd.f32 10.0, %v889_v44  ;;  %v896_v31 = vmul.f32 %v894_v18, %v892_v9 }
 0x67c   :  { %v877_v59 = vadd.f32 14484.914, %v875_v51  ;;  %v932_v16 = vmul.f32 %v930_v5, %v1871_v17  ;;  %v898_v32 = vadd.f32 12.0, %v888_v36  ;;  %1422 = vlog2.f32 %v905_v41 }
 0x67d   :  { %v878_v0 = vmul.f32 %v876_v55, %v1849_v63  ;;  %v933_v21 = vadd.f32 14484.914, %v931_v15  ;;  %v1914_v29 = vpop.eup %1414  ;;  %v897_v40 = vmul.f32 %v895_v30, %v893_v46  ;;  %v899_v42 = vadd.f32 12.0, %v889_v44 }
 0x67e   :  { %v879_v13 = vmul.f32 %v877_v59, %v1856_v3  ;;  %v934_v22 = vadd.f32 14484.914, %v932_v16  ;;  %v1918_v39 = vpop.eup %1416  ;;  %v1021_v43 = vmul.f32 %v1019_v1, %v1836_v57  ;;  %v1022_v45 = vmul.f32 %v1020_v28, %v1839_v60 }
 0x67f   :  { %v880_v34 = vadd.f32 32281.064, %v878_v0  ;;  %v935_v37 = vmul.f32 %v933_v21, %v1865_v14  ;;  %v1922_v47 = vpop.eup %1418  ;;  %v949_v48 = vmul.f32 %v947_v24, %v1865_v14  ;;  %v950_v36 = vmul.f32 %v948_v25, %v1871_v17 }
 0x680   :  { %v881_v35 = vadd.f32 32281.064, %v879_v13  ;;  %v936_v38 = vmul.f32 %v934_v22, %v1871_v17  ;;  %v951_v49 = vadd.f32 10.0, %v945_v6  ;;  %v952_v50 = vadd.f32 10.0, %v1897_v61 }
 0x681   :  { %v1927_v51 = vmul.f32 %v898_v32, %v896_v31  ;;  %v937_v53 = vadd.f32 32281.064, %v935_v37  ;;  %v1023_v55 = vadd.f32 466.3342, %v1021_v43  ;;  %v1024_v56 = vadd.f32 466.3342, %v1022_v45 }
 0x682   :  { %v882_v44 = vmul.f32 %v880_v34, %v1849_v63  ;;  %v883_v58 = vmul.f32 %v881_v35, %v1856_v3  ;;  %v938_v59 = vadd.f32 32281.064, %v936_v38  ;;  %v961_v33 = vadd.f32 5.5, %v1865_v14 }
 0x683   :  { %v1932_v23 = vmul.f32 %v899_v42, %v897_v40  ;;  %v1025_v1 = vmul.f32 %v1023_v55, %v1836_v57  ;;  %v1026_v4 = vmul.f32 %v1024_v56, %v1839_v60  ;;  %v1043_v5 = vmul.f32 %v1041_v10, %v1836_v57  ;;  %v1944_v13 = vpop.eup %1420 }
 0x684   :  { %v1937_v9 = vmul.f32 %v951_v49, %v949_v48  ;;  %v1939_v41 = vmul.f32 %v952_v50, %v950_v36  ;;  %v1941_v28 = vadd.f32 12.0, %v945_v6  ;;  %v1044_v0 = vmul.f32 %v1042_v20, %v1839_v60 }
 0x685   :  { %v939_v15 = vmul.f32 %v937_v53, %v1865_v14  ;;  %v962_v16 = vadd.f32 5.5, %v1871_v17  ;;  %v1027_v46 = vadd.f32 3465.7095, %v1025_v1  ;;  %v1028_v18 = vadd.f32 3465.7095, %v1026_v4 }
 0x686   :  { %v1948_v21 = vadd.f32 29969.594, %v882_v44  ;;  %v1950_v22 = vadd.f32 29969.594, %v883_v58  ;;  %v940_v10 = vmul.f32 %v938_v59, %v1871_v17  ;;  %1424 = vlog2.f32 %v961_v33  ;;  %v1953_v24 = vpop.eup %1422 }
 0x687   :  { %v1029_v6 = vmul.f32 %v1027_v46, %v1836_v57  ;;  %v1030_v20 = vmul.f32 %v1028_v18, %v1839_v60  ;;  %v1045_v25 = vadd.f32 6.0, %v1043_v5  ;;  %v1049_v30 = vadd.f32 10.0, %v1043_v5 }
 0x688   :  { %v1046_v31 = vadd.f32 6.0, %v1044_v0  ;;  %v1050_v32 = vadd.f32 10.0, %v1044_v0  ;;  %v1067_v34 = vadd.f32 33.458332, %v1845_v62  ;;  %v1068_v35 = vadd.f32 33.458332, %v1852_v2 }
 0x689   :  { %v1959_v37 = vadd.f32 29969.594, %v939_v15  ;;  %1426 = vlog2.f32 %v962_v16  ;;  %v1031_v38 = vadd.f32 14484.914, %v1029_v6  ;;  %v1032_v40 = vadd.f32 14484.914, %v1030_v20 }
 0x68a   :  { %v1069_v42 = vmul.f32 %v1067_v34, %v1845_v62  ;;  %v1070_v43 = vmul.f32 %v1068_v35, %v1852_v2  ;;  %v1089_v45 = vadd.f32 7.0, %v1845_v62  ;;  %v1090_v48 = vadd.f32 7.0, %v1852_v2 }
 0x68b   :  { %v1965_v36 = vadd.f32 29969.594, %v940_v10  ;;  %v1033_v49 = vmul.f32 %v1031_v38, %v1836_v57  ;;  %v1034_v50 = vmul.f32 %v1032_v40, %v1839_v60  ;;  %v1047_v53 = vmul.f32 %v1045_v25, %v1836_v57 }
 0x68c   :  { %v1048_v55 = vmul.f32 %v1046_v31, %v1839_v60  ;;  %v1071_v56 = vadd.f32 466.3342, %v1069_v42  ;;  %v1072_v44 = vadd.f32 466.3342, %v1070_v43  ;;  %v1091_v58 = vmul.f32 %v1089_v45, %v1845_v62 }
 0x68d   :  { %v1035_v59 = vadd.f32 32281.064, %v1033_v49  ;;  %v1036_v33 = vadd.f32 32281.064, %v1034_v50  ;;  %v1053_v1 = vadd.f32 12.0, %v1043_v5  ;;  %v1092_v4 = vmul.f32 %v1090_v48, %v1852_v2 }
 0x68e   :  { %v1059_v15 = vadd.f32 5.5, %v1836_v57  ;;  %v1073_v16 = vmul.f32 %v1071_v56, %v1845_v62  ;;  %v1074_v46 = vmul.f32 %v1072_v44, %v1852_v2  ;;  %v1093_v18 = vadd.f32 6.0, %v1091_v58 }
 0x68f   :  { %v1051_v10 = vmul.f32 %v1049_v30, %v1047_v53  ;;  %v1054_v6 = vadd.f32 12.0, %v1044_v0  ;;  %v1060_v20 = vadd.f32 5.5, %v1839_v60  ;;  %v1094_v25 = vadd.f32 6.0, %v1092_v4 }
 0x690   :  { %v1977_v31 = vpop.eup %1424  ;;  %v1052_v34 = vmul.f32 %v1050_v32, %v1048_v55  ;;  %v1075_v35 = vadd.f32 3465.7095, %v1073_v16  ;;  %v1076_v38 = vadd.f32 3465.7095, %v1074_v46  ;;  %v1095_v5 = vmul.f32 %v1093_v18, %v1845_v62 }
 0x691   :  { %v1037_v40 = vmul.f32 %v1035_v59, %v1836_v57  ;;  %v1038_v42 = vmul.f32 %v1036_v33, %v1839_v60  ;;  %v1096_v43 = vmul.f32 %v1094_v25, %v1852_v2  ;;  %v1097_v45 = vadd.f32 10.0, %v1091_v58 }
 0x692   :  { %1428 = vlog2.f32 %v1059_v15  ;;  %v1077_v0 = vmul.f32 %v1075_v35, %v1845_v62  ;;  %v1078_v30 = vmul.f32 %v1076_v38, %v1852_v2  ;;  %v1098_v48 = vadd.f32 10.0, %v1092_v4 }
 0x693   :  { %v1427_v49 = vpop.eup %1426  ;;  %v1055_v50 = vmul.f32 %v1053_v1, %v1051_v10  ;;  %1430 = vlog2.f32 %v1060_v20  ;;  %v1099_v32 = vmul.f32 %v1097_v45, %v1095_v5  ;;  %v1107_v53 = vadd.f32 5.5, %v1845_v62 }
 0x694   :  { %v1056_v55 = vmul.f32 %v1054_v6, %v1052_v34  ;;  %v1079_v56 = vadd.f32 14484.914, %v1077_v0  ;;  %v1080_v44 = vadd.f32 14484.914, %v1078_v30  ;;  %v1100_v59 = vmul.f32 %v1098_v48, %v1096_v43 }
 0x695   :  { %v1039_v33 = vadd.f32 29969.594, %v1037_v40  ;;  %v1040_v16 = vadd.f32 29969.594, %v1038_v42  ;;  %v1101_v46 = vadd.f32 12.0, %v1091_v58  ;;  %v1108_v15 = vadd.f32 5.5, %v1852_v2 }
 0x696   :  { %v1081_v18 = vmul.f32 %v1079_v56, %v1845_v62  ;;  %v1082_v25 = vmul.f32 %v1080_v44, %v1852_v2  ;;  %v1102_v35 = vadd.f32 12.0, %v1092_v4  ;;  %1432 = vlog2.f32 %v1107_v53 }
 0x697   :  { %v956_v1 = vadd.f32 12.0, %v1897_v61  ;;  %v1103_v10 = vmul.f32 %v1101_v46, %v1099_v32  ;;  %1434 = vlog2.f32 %v1108_v15  ;;  %v1123_v6 = vmul.f32 %v1055_v50, %v1948_v21 }
 0x698   :  { %v1083_v20 = vadd.f32 32281.064, %v1081_v18  ;;  %v1084_v34 = vadd.f32 32281.064, %v1082_v25  ;;  %v1104_v38 = vmul.f32 %v1102_v35, %v1100_v59  ;;  %v1124_v5 = vmul.f32 %v1056_v55, %v1950_v22 }
 0x699   :  { %1436 = vlog2.f32 %v1123_v6  ;;  %v1129_v58 = vmul.f32 %v1039_v33, %v1927_v51  ;;  %v1130_v40 = vmul.f32 %v1040_v16, %v1932_v23  ;;  %v1137_v42 = vmul.f32 %v1103_v10, %v1959_v37 }
 0x69a   :  { %v1085_v4 = vmul.f32 %v1083_v20, %v1845_v62  ;;  %v1086_v61 = vmul.f32 %v1084_v34, %v1852_v2  ;;  %1438 = vlog2.f32 %v1124_v5  ;;  %v1138_v43 = vmul.f32 %v1104_v38, %v1965_v36 }
 0x69b   :  { %v957_v21 = vmul.f32 %v1941_v28, %v1937_v9  ;;  %v992_v45 = vadd.f32 29969.594, %v1889_v54  ;;  %v1014_v22 = vmul.f32 0.6931472, %v1899_v8  ;;  %1440 = vlog2.f32 %v1129_v58 }
 0x69c   :  { %v1429_v51 = vpop.eup %1428  ;;  %v958_v23 = vmul.f32 %v956_v1, %v1939_v41  ;;  %v1087_v0 = vadd.f32 29969.594, %v1085_v4  ;;  %v1088_v37 = vadd.f32 29969.594, %v1086_v61  ;;  %1442 = vlog2.f32 %v1130_v40 }
 0x69d   :  { %v1431_v30 = vpop.eup %1430  ;;  %v1016_v48 = vmul.f32 0.6931472, %v1909_v12  ;;  %1444 = vlog2.f32 %v1137_v42  ;;  %v1009_v36 = vadd.f32 0.5, %v1816_v7  ;;  %v1010_v54 = vadd.f32 0.5, %v1822_v11 }
 0x69e   :  { %1446 = vlog2.f32 %v1138_v43  ;;  %v1145_v50 = vmul.f32 %v1087_v0, %v957_v21  ;;  %v1146_v9 = vmul.f32 %v1088_v37, %v958_v23  ;;  %v1062_v28 = vmul.f32 0.6931472, %v1429_v51  ;;  %v60_v0 = vld [vmem:[%s2053_s3] sm:$0xff] }
 0x69f   :  { %1448 = vlog2.f32 %v992_v45  ;;  %v1017_v32 = vmul.f32 %v1014_v22, %v1009_v36  ;;  %v1064_v53 = vmul.f32 0.6931472, %v1431_v30  ;;  %v964_v55 = vmul.f32 0.6931472, %v1977_v31 }
 0x6a0   :  { %v1433_v8 = vpop.eup %1432  ;;  %1450 = vlog2.f32 %v1145_v50  ;;  %v1018_v56 = vmul.f32 %v1016_v48, %v1010_v54  ;;  %v1057_v12 = vadd.f32 0.5, %v1836_v57  ;;  %v902_v7 = vadd.f32 0.5, %v1849_v63  ;;  %v61_v50 = vld [vmem:[%s2053_s3 + $0x8] sm:$0xff] }
 0x6a1   :  { %v1435_v41 = vpop.eup %1434  ;;  %1452 = vlog2.f32 %v1146_v9  ;;  %v907_v44 = vmul.f32 0.6931472, %v1944_v13  ;;  %v966_v59 = vmul.f32 0.6931472, %v1427_v49  ;;  %v1058_v11 = vadd.f32 0.5, %v1839_v60 }
 0x6a2   :  { %v909_v16 = vmul.f32 0.6931472, %v1953_v24  ;;  %v959_v46 = vadd.f32 0.5, %v1865_v14  ;;  %v1065_v15 = vmul.f32 %v1062_v28, %v1057_v12  ;;  %v1110_v18 = vmul.f32 0.6931472, %v1433_v8 }
 0x6a3   :  { %v1437_v33 = vpop.eup %1436  ;;  %v960_v31 = vadd.f32 0.5, %v1871_v17  ;;  %v1066_v35 = vmul.f32 %v1064_v53, %v1058_v11  ;;  %v1112_v57 = vmul.f32 0.6931472, %v1435_v41  ;;  %v903_v63 = vadd.f32 0.5, %v1856_v3  ;;  %v1165_v17 = vld [vmem:[%s2052_s16] sm:$0x3] }
 0x6a4   :  { %v1439_v25 = vpop.eup %1438  ;;  %v1126_v1 = vmul.f32 0.6931472, %v1437_v33  ;;  %v967_v13 = vmul.f32 %v964_v55, %v959_v46  ;;  %v1105_v49 = vadd.f32 0.5, %v1845_v62  ;;  %v910_v20 = vmul.f32 %v907_v44, %v902_v7 }
 0x6a5   :  { %v1441_v10 = vpop.eup %1440  ;;  %v1128_v60 = vmul.f32 0.6931472, %v1439_v25  ;;  %v968_v24 = vmul.f32 %v966_v59, %v960_v31  ;;  %v1106_v14 = vadd.f32 0.5, %v1852_v2  ;;  %v911_v5 = vmul.f32 %v909_v16, %v903_v63 }
 0x6a6   :  { %v1443_v6 = vpop.eup %1442  ;;  %v1132_v34 = vmul.f32 0.6931472, %v1441_v10  ;;  %v1113_v58 = vmul.f32 %v1110_v18, %v1105_v49  ;;  %v1117_v40 = vadd.f32 %v1065_v15, %v1017_v32  ;;  %v1118_v61 = vadd.f32 %v1066_v35, %v1018_v56 }
 0x6a7   :  { %v1445_v38 = vpop.eup %1444  ;;  %v1134_v42 = vmul.f32 0.6931472, %v1443_v6  ;;  %v1114_v4 = vmul.f32 %v1112_v57, %v1106_v14  ;;  %v1115_v45 = vadd.f32 %v967_v13, %v910_v20  ;;  %v1170_v2 = vrot.slane %v1165_v17, %v1779_v26  ;;  %v1193_v57 = vpop.permute.xlu0 %1192 }
 0x6a8   :  { %v1447_v3 = vpop.eup %1446  ;;  %v1135_v62 = vsub.f32 %v1126_v1, %v1132_v34  ;;  %v1140_v43 = vmul.f32 0.6931472, %v1445_v38  ;;  %v1116_v37 = vadd.f32 %v968_v24, %v911_v5  ;;  %v1174_v48 = vrot.slane %v1165_v17, %v1781_v27 }
 0x6a9   :  { %v1449_v21 = vpop.eup %1448  ;;  %v1136_v22 = vsub.f32 %v1128_v60, %v1134_v42  ;;  %v1142_v51 = vmul.f32 0.6931472, %v1447_v3  ;;  %v1119_v9 = vadd.f32 %v1117_v40, %v1113_v58  ;;  %v1120_v8 = vadd.f32 %v1118_v61, %v1114_v4 }
 0x6aa   :  { %v1451_v23 = vpop.eup %1450  ;;  %v1143_v30 = vadd.f32 %v1140_v43, %v1135_v62  ;;  %v1154_v41 = vmul.f32 0.6931472, %v1914_v29  ;;  %v1177_v55 = vadd.f32 %v1170_v2, %v60_v0  ;;  %v1156_v7 = vmul.f32 0.6931472, %v1918_v39 }
 0x6ab   :  { %v1453_v36 = vpop.eup %1452  ;;  %v1144_v54 = vadd.f32 %v1142_v51, %v1136_v22  ;;  %v1148_v28 = vmul.f32 0.6931472, %v1451_v23  ;;  %v1121_v26 = vsub.f32 %v1115_v45, %v1119_v9  ;;  %v1122_v56 = vsub.f32 %v1116_v37, %v1120_v8 }
 0x6ac   :  { %v1150_v32 = vmul.f32 0.6931472, %v1453_v36  ;;  %v1178_v27 = vadd.f32 %v1174_v48, %v61_v50  ;;  %v1160_v59 = vmul.f32 0.6931472, %v1922_v47  ;;  %v1162_v33 = vmul.f32 0.6931472, %v1449_v21 }
 0x6ad   :  { %v1151_v53 = vsub.f32 %v1143_v30, %v1148_v28  ;;  %v1179_v46 = vadd.f32 %v1177_v55, %v1121_v26  ;;  %v1195_v1 = vadd.f32 %v1193_v57, %v1802_v52  ;;  %v1187_v10 = vsub.f32 -2.3025851, %v1733_v19 }
 0x6ae   :  { %v1152_v12 = vsub.f32 %v1144_v54, %v1150_v32  ;;  %v1180_v18 = vadd.f32 %v1178_v27, %v1122_v56 }
 0x6af   :  { %v1157_v44 = vadd.f32 %v1154_v41, %v1151_v53  ;;  %v1196_v39 = vmul.f32 50.0, %v1195_v1 }
 0x6b0   :  { %v1158_v11 = vadd.f32 %v1156_v7, %v1152_v12 }
 0x6b1   :  { %v1163_v16 = vsub.f32 %v1157_v44, %v1160_v59  ;;  %v1197_v47 = vadd.f32 %v1196_v39, %v1187_v10 }
 0x6b2   :  { %v1164_v15 = vsub.f32 %v1158_v11, %v1162_v33 }
 0x6b3   :  { %v1181_v25 = vadd.f32 %v1179_v46, %v1163_v16  ;;  %v1263_v13 = vadd.f32 -0.5, %v1197_v47 }
 0x6b4   :  { %v1182_v31 = vadd.f32 %v1180_v18, %v1164_v15 }
 0x6b6   :  { %v1183_v35 = vsel %vm95_vm0, %v1182_v31, 0.0 }
 0x6b7   :  { %v1184_v29 = vadd.f32 %v1183_v35, %v1181_v25 }
 0x6b9   :  { %1185 = vadd.xlane.f32.xlu1 %v1184_v29 }
 0x6bf   :  { %v1223_v63 = vpop.permute.xlu0 %1222 }
 0x6c0   :  { %v1225_v60 = vadd.f32 %v1263_v13, %v1223_v63 }
 0x6c3   :  { %v1228_v49 = vpop.permute.xlu0 %1227 }
 0x6c4   :  { %v1230_v6 = vadd.f32 %v1228_v49, %v1225_v60 }
 0x746   :  { %v1186_v20 = vpop.xlane.xlu1 %1185 }
 0x747   :  { %v1232_v24 = vsel %vm1231_vm7, %v1186_v20, %v1230_v6 }
 0x748   :  { %1234 = vst.msk [vmem:[%s2054_s17] sm:$0xff] %vm1233_vm8, %v1232_v24 }

</bundles_post_ra>
